<compile_context>
chip_gen: v5e
topology: v5e:2x2
jax: 0.10.0
libtpu: 0.0.40
codegen_flags: <defaults>
</compile_context>

<pallas_src>
import functools

import jax
import jax.numpy as jnp
import numpy as np
from jax.experimental import pallas as pl
from jax.experimental.pallas import tpu as pltpu

LN_EPS = 1e-5
NEG_INF = -1e30  # large negative instead of -inf keeps softmax NaN-free


def _layernorm(x, g, b):
    mu = jnp.mean(x, axis=-1, keepdims=True)
    var = jnp.mean(jnp.square(x - mu), axis=-1, keepdims=True)
    return (x - mu) * jax.lax.rsqrt(var + LN_EPS) * g + b


def _gelu(x):
    # tanh-approximate GELU (EUP-friendly inside the kernel)
    c = 0.7978845608028654  # sqrt(2/pi)
    return 0.5 * x * (1.0 + jnp.tanh(c * (x + 0.044715 * x * x * x)))


# ----------------------------- Pallas kernels --------------------------------


def transformer_block_kernel(*refs, num_heads, q_tile, has_alibi, fuse_final_ln):
    """One pre-norm transformer block; grid = (batch, Q-tile)."""
    i = 0
    x_ref = refs[i]; i += 1            # (1, T, D)   bf16 full sequence (resident per b)
    pad_ref = refs[i]; i += 1          # (1, 1, T)   f32 additive key-padding bias
    ab_ref = scale_ref = None
    if has_alibi:
        ab_ref = refs[i]               # (1, H, Tq, T) bf16 unscaled alibi (streamed per Q tile)
        scale_ref = refs[i + 1]        # (1,) f32 per-layer scale in SMEM
        i += 2
    (ln1_g_ref, ln1_b_ref,
     wq_ref, bq_ref, wk_ref, bk_ref, wv_ref, bv_ref,
     wo_ref, bo_ref,
     ln2_g_ref, ln2_b_ref, w1_ref, b1_ref, w2_ref, b2_ref) = refs[i:i + 16]
    i += 16
    encg_ref = encb_ref = None
    if fuse_final_ln:
        encg_ref, encb_ref = refs[i:i + 2]
        i += 2
    o_ref = refs[i]; i += 1            # (1, Tq, D)
    k_sc, v_sc = refs[i:i + 2]         # (H, T, hd) bf16 scratch

    H = num_heads
    Tq = q_tile
    D = x_ref.shape[2]
    hd = D // H
    sm_scale = 1.0 / float(np.sqrt(hd))
    qi = pl.program_id(1)

    # ---- K/V for the whole sequence: computed once per batch element, kept in VMEM ----
    @pl.when(qi == 0)
    def _():
        xf = x_ref[0].astype(jnp.float32)                                    # (T, D)
        xnf = _layernorm(xf, ln1_g_ref[...], ln1_b_ref[...]).astype(jnp.bfloat16)
        for h in range(H):  # clean 2-D MXU dots, written straight into head-major scratch
            k_sc[h] = (jnp.dot(xnf, wk_ref[h], preferred_element_type=jnp.float32)
                       + bk_ref[h]).astype(jnp.bfloat16)
            v_sc[h] = (jnp.dot(xnf, wv_ref[h], preferred_element_type=jnp.float32)
                       + bv_ref[h]).astype(jnp.bfloat16)

    # ---- this Q tile: rows [qi*Tq, (qi+1)*Tq) ----
    q0 = pl.multiple_of(qi * Tq, Tq)
    x_t = x_ref[0, pl.ds(q0, Tq), :].astype(jnp.float32)                     # (Tq, D) f32
    xn = _layernorm(x_t, ln1_g_ref[...], ln1_b_ref[...]).astype(jnp.bfloat16)
    q3 = jnp.stack(
        [jnp.dot(xn, wq_ref[h], preferred_element_type=jnp.float32) + bq_ref[h]
         for h in range(H)], axis=0).astype(jnp.bfloat16)                    # (H, Tq, hd)

    k3 = k_sc[...]                                                           # (H, T, hd) bf16
    v3 = v_sc[...]

    s = jnp.einsum('hqd,hkd->hqk', q3, k3,
                   preferred_element_type=jnp.float32) * sm_scale            # (H, Tq, T) f32
    if has_alibi:
        s = s + ab_ref[0].astype(jnp.float32) * scale_ref[0]                 # per-layer scale
    s = s + pad_ref[...]                                                     # additive key mask
    s = s - jnp.max(s, axis=-1, keepdims=True)
    p = jnp.exp(s)
    p = p * pl.reciprocal(jnp.sum(p, axis=-1, keepdims=True), approx=True)

    ctx = jnp.einsum('hqk,hkd->hqd', p.astype(jnp.bfloat16), v3,
                     preferred_element_type=jnp.float32)                     # (H, Tq, hd)
    ctx_all = jnp.concatenate([ctx[h] for h in range(H)], axis=-1)           # (Tq, D)
    attn = jnp.dot(ctx_all.astype(jnp.bfloat16), wo_ref[...],
                   preferred_element_type=jnp.float32) + bo_ref[...]         # full-K out proj
    x_t = x_t + attn

    # ---- MLP (pre-norm) ----
    xn2 = _layernorm(x_t, ln2_g_ref[...], ln2_b_ref[...]).astype(jnp.bfloat16)
    h1 = _gelu(jnp.dot(xn2, w1_ref[...], preferred_element_type=jnp.float32)
               + b1_ref[...])
    mlp = jnp.dot(h1.astype(jnp.bfloat16), w2_ref[...],
                  preferred_element_type=jnp.float32) + b2_ref[...]
    y = x_t + mlp

    if fuse_final_ln:   # fused encoder-level LayerNorm (layer_norm_first=True epilogue)
        y = _layernorm(y, encg_ref[...], encb_ref[...])

    o_ref[0] = y.astype(o_ref.dtype)


def layernorm_kernel(x_ref, g_ref, b_ref, o_ref):
    o_ref[0] = _layernorm(x_ref[0].astype(jnp.float32),
                          g_ref[...], b_ref[...]).astype(o_ref.dtype)


# ------------------------------- wrappers -------------------------------------


def _prep_block_params(p, num_heads):
    """Host-side one-time relayout: per-head (H, D, hd) weights, bf16 matmul weights."""
    D = p["wqkv"].shape[0]
    H = num_heads
    hd = D // H

    def split_w(w):   # (D, D) -> (H, D, hd) bf16
        return jnp.transpose(w.reshape(D, H, hd), (1, 0, 2)).astype(jnp.bfloat16)

    def split_b(b):   # (1, D) -> (H, 1, hd) f32
        return jnp.transpose(b.reshape(1, H, hd), (1, 0, 2)).astype(jnp.float32)

    wqkv, bqkv = p["wqkv"], p["bqkv"]
    return dict(
        ln1_g=p["ln1_g"].astype(jnp.float32), ln1_b=p["ln1_b"].astype(jnp.float32),
        wq=split_w(wqkv[:, :D]),        bq=split_b(bqkv[:, :D]),
        wk=split_w(wqkv[:, D:2 * D]),   bk=split_b(bqkv[:, D:2 * D]),
        wv=split_w(wqkv[:, 2 * D:]),    bv=split_b(bqkv[:, 2 * D:]),
        wo=p["wo"].astype(jnp.bfloat16), bo=p["bo"].astype(jnp.float32),
        ln2_g=p["ln2_g"].astype(jnp.float32), ln2_b=p["ln2_b"].astype(jnp.float32),
        w1=p["w1"].astype(jnp.bfloat16), b1=p["b1"].astype(jnp.float32),
        w2=p["w2"].astype(jnp.bfloat16), b2=p["b2"].astype(jnp.float32),
    )


def run_block(x, pad_bias, ab, scale, params, *, num_heads, q_tile,
              fuse_final_ln, enc_ln, out_dtype):
    """x: [B,T,D] bf16; pad_bias: [B,1,T] f32 additive; ab: [B,H,T,T] bf16 or None."""
    B, T, D = x.shape
    H = num_heads
    hd = D // H
    Dff = params["w1"].shape[1]
    nq = T // q_tile
    has_alibi = ab is not None

    def rep(arr):
        return pl.BlockSpec(arr.shape, lambda b, q, n=arr.ndim: (0,) * n)

    in_specs = [
        pl.BlockSpec((1, T, D), lambda b, q: (b, 0, 0)),       # x: full sequence, resident per b
        pl.BlockSpec((1, 1, T), lambda b, q: (b, 0, 0)),       # additive key-padding bias
    ]
    inputs = [x, pad_bias]
    if has_alibi:
        in_specs += [
            pl.BlockSpec((1, H, q_tile, T), lambda b, q: (b, 0, q, 0)),   # alibi streamed per Q tile
            pl.BlockSpec(memory_space=pltpu.MemorySpace.SMEM),            # per-layer scale scalar
        ]
        inputs += [ab, scale]

    weight_keys = ("ln1_g", "ln1_b", "wq", "bq", "wk", "bk", "wv", "bv",
                   "wo", "bo", "ln2_g", "ln2_b", "w1", "b1", "w2", "b2")
    for kname in weight_keys:
        in_specs.append(rep(params[kname]))
        inputs.append(params[kname])
    if fuse_final_ln:
        g, b = enc_ln
        in_specs += [rep(g), rep(b)]
        inputs += [g, b]

    kernel = functools.partial(transformer_block_kernel, num_heads=H, q_tile=q_tile,
                               has_alibi=has_alibi, fuse_final_ln=fuse_final_ln)

    # advisory cost estimate for XLA scheduling around the L sequential layer calls
    flops = B * (8 * T * D * D + 4 * T * T * D + 4 * T * D * Dff)
    transc = B * (H * T * T + T * Dff)
    w_bytes = sum(int(np.prod(params[k].shape)) * params[k].dtype.itemsize
                  for k in weight_keys)
    bytes_accessed = (x.size * x.dtype.itemsize
                      + B * T * D * jnp.dtype(out_dtype).itemsize
                      + (ab.size * ab.dtype.itemsize if has_alibi else 0)
                      + pad_bias.size * 4 + w_bytes)

    return pl.pallas_call(
        kernel,
        out_shape=jax.ShapeDtypeStruct((B, T, D), out_dtype),
        grid=(B, nq),
        in_specs=in_specs,
        out_specs=pl.BlockSpec((1, q_tile, D), lambda b, q: (b, q, 0)),
        scratch_shapes=[pltpu.VMEM((H, T, hd), jnp.bfloat16),   # K scratch (per batch elem)
                        pltpu.VMEM((H, T, hd), jnp.bfloat16)],  # V scratch
        compiler_params=pltpu.CompilerParams(
            dimension_semantics=("parallel", "arbitrary"),
            vmem_limit_bytes=48 * 1024 * 1024),
        cost_estimate=pl.CostEstimate(flops=int(flops), transcendentals=int(transc),
                                      bytes_accessed=int(bytes_accessed)),
    )(*inputs)


def run_layernorm(x, g, b):
    # standalone encoder-LN (only used for the not-layer_norm_first prologue path)
    B, T, D = x.shape
    return pl.pallas_call(
        layernorm_kernel,
        out_shape=jax.ShapeDtypeStruct((B, T, D), x.dtype),
        grid=(B,),
        in_specs=[pl.BlockSpec((1, T, D), lambda i: (i, 0, 0)),
                  pl.BlockSpec((1, D), lambda i: (0, 0)),
                  pl.BlockSpec((1, D), lambda i: (0, 0))],
        out_specs=pl.BlockSpec((1, T, D), lambda i: (i, 0, 0)),
        compiler_params=pltpu.CompilerParams(dimension_semantics=("parallel",)),
    )(x, g, b)


class BlockEncoderPallas:
    """Pallas analogue of the PyTorch BlockEncoder (inference mode)."""

    def __init__(self, block_params, norm_params, layer_norm_first, layerdrop,
                 dropout, num_heads, q_tile=None):
        self.num_heads = num_heads
        self.block_params = [_prep_block_params(p, num_heads) for p in block_params]
        self.norm_params = norm_params           # (gamma, beta) each (1, D), or None
        self.layer_norm_first = layer_norm_first
        self.layerdrop = layerdrop               # unused at inference (blocks never dropped)
        self.dropout = dropout                   # nn.Dropout is identity at inference
        self.q_tile = q_tile

    def __call__(self, x, padding_mask, alibi_bias, alibi_scale):
        B, T, D = x.shape
        if self.norm_params is not None and not self.layer_norm_first:
            x = run_layernorm(x, *self.norm_params)
        # dropout: identity at inference
        L = len(self.block_params)
        if L == 0:
            if self.norm_params is not None and self.layer_norm_first:
                x = run_layernorm(x, *self.norm_params)
            return x

        q_tile = self.q_tile
        if q_tile is None or q_tile > T or T % q_tile != 0:
            q_tile = T
            for cand in (256, 128):
                if T % cand == 0:
                    q_tile = cand
                    break

        if padding_mask is None:
            pad_bias = jnp.zeros((B, 1, T), jnp.float32)
        else:
            pad_bias = jnp.where(padding_mask > 0, NEG_INF, 0.0).astype(jnp.float32)

        ab16 = None if alibi_bias is None else alibi_bias.astype(jnp.bfloat16)
        x = x.astype(jnp.bfloat16)               # bf16 layer-boundary activations

        for i, params in enumerate(self.block_params):
            is_last = (i == L - 1)
            fuse_final = (is_last and self.layer_norm_first
                          and self.norm_params is not None)
            if ab16 is not None:
                if alibi_scale is not None:
                    scale_i = (alibi_scale[i] if alibi_scale.shape[0] > 1
                               else jnp.squeeze(alibi_scale, 0))
                    scale_arr = jnp.reshape(scale_i, (-1,))[:1].astype(jnp.float32)
                else:
                    scale_arr = jnp.ones((1,), jnp.float32)
            else:
                scale_arr = None
            x = run_block(
                x, pad_bias, ab16, scale_arr, params,
                num_heads=self.num_heads, q_tile=q_tile,
                fuse_final_ln=fuse_final,
                enc_ln=self.norm_params if fuse_final else None,
                out_dtype=jnp.float32 if is_last else jnp.bfloat16)
        return x


# -------------------------- pure-JAX reference ---------------------------------


def _ref_block(x, pad, ab, p, H):
    B, T, D = x.shape
    hd = D // H

    def ln(y, g, b):
        mu = y.mean(-1, keepdims=True)
        var = ((y - mu) ** 2).mean(-1, keepdims=True)
        return (y - mu) / jnp.sqrt(var + LN_EPS) * g[0] + b[0]

    xn = ln(x, p["ln1_g"], p["ln1_b"])
    qkv = xn @ p["wqkv"] + p["bqkv"][0]
    q, k, v = jnp.split(qkv, 3, axis=-1)
    q = q.reshape(B, T, H, hd)
    k = k.reshape(B, T, H, hd)
    v = v.reshape(B, T, H, hd)
    s = jnp.einsum('bthd,bshd->bhts', q, k) / np.sqrt(hd) + ab
    s = jnp.where(pad[:, :, None, :] > 0, NEG_INF, s)
    a = jax.nn.softmax(s, axis=-1)
    ctx = jnp.einsum('bhts,bshd->bthd', a, v).reshape(B, T, D)
    x = x + ctx @ p["wo"] + p["bo"][0]
    xn2 = ln(x, p["ln2_g"], p["ln2_b"])
    h1 = _gelu(xn2 @ p["w1"] + p["b1"][0])
    return x + h1 @ p["w2"] + p["b2"][0]


def _ref_encoder(x, pad, ab, ab_scale, block_params, norm_params, H):
    for i, p in enumerate(block_params):
        scale = ab_scale[i] if ab_scale.shape[0] > 1 else jnp.squeeze(ab_scale, 0)
        x = _ref_block(x, pad, ab * scale, p, H)
    g, b = norm_params
    mu = x.mean(-1, keepdims=True)
    var = ((x - mu) ** 2).mean(-1, keepdims=True)
    return (x - mu) / jnp.sqrt(var + LN_EPS) * g[0] + b[0]


# --------------------------------- main ----------------------------------------


def init_block_params(key, D, Dff):
    ks = jax.random.split(key, 4)
    w = lambda k, shape: jax.random.normal(k, shape, jnp.float32) * 0.02
    return dict(
        ln1_g=jnp.ones((1, D), jnp.float32), ln1_b=jnp.zeros((1, D), jnp.float32),
        wqkv=w(ks[0], (D, 3 * D)), bqkv=jnp.zeros((1, 3 * D), jnp.float32),
        wo=w(ks[1], (D, D)), bo=jnp.zeros((1, D), jnp.float32),
        ln2_g=jnp.ones((1, D), jnp.float32), ln2_b=jnp.zeros((1, D), jnp.float32),
        w1=w(ks[2], (D, Dff)), b1=jnp.zeros((1, Dff), jnp.float32),
        w2=w(ks[3], (Dff, D)), b2=jnp.zeros((1, D), jnp.float32),
    )


if __name__ == "__main__":
    B, T, D, H, L = 2, 32, 32, 4, 2
    Dff = 2 * D

    root = jax.random.PRNGKey(0)
    k_x, k_ab, k_scale, k_norm, k_layers = jax.random.split(root, 5)

    x = jax.random.normal(k_x, (B, T, D), jnp.float32)
    # padding mask: 1.0 = padded key. batch 1 has its last 4 positions padded.
    pad_np = np.zeros((B, 1, T), np.float32)
    pad_np[1, 0, -4:] = 1.0
    padding_mask = jnp.asarray(pad_np)
    alibi_bias = jax.random.normal(k_ab, (B, H, T, T), jnp.float32) * 0.1
    alibi_scale = jnp.abs(jax.random.normal(k_scale, (L, 1, 1, 1), jnp.float32)) + 0.5

    layer_keys = jax.random.split(k_layers, L)
    block_params = [init_block_params(layer_keys[i], D, Dff) for i in range(L)]
    kg, kb = jax.random.split(k_norm)
    norm_params = (1.0 + 0.1 * jax.random.normal(kg, (1, D), jnp.float32),
                   0.1 * jax.random.normal(kb, (1, D), jnp.float32))

    encoder = BlockEncoderPallas(
        block_params=block_params,
        norm_params=norm_params,
        layer_norm_first=True,   # final LayerNorm after the blocks (fused into last block)
        layerdrop=0.0,
        dropout=0.0,
        num_heads=H,
        q_tile=16,               # 2 Q tiles per batch element -> exercises the tiled path
    )

    out = encoder(x, padding_mask, alibi_bias, alibi_scale)
    out = jax.block_until_ready(out)

    ref = _ref_encoder(x, padding_mask, alibi_bias, alibi_scale,
                       block_params, norm_params, H)
    ref = jax.block_until_ready(ref)

    assert out.shape == (B, T, D) and out.dtype == jnp.float32
    assert bool(jnp.all(jnp.isfinite(out)))
    # bf16 layer-boundary activations + bf16 matmul operands (f32 accumulate) are an
    # intentional inference-precision tradeoff; reference is full f32.
    np.testing.assert_allclose(np.asarray(out), np.asarray(ref), rtol=3e-2, atol=3e-2)

    print("KERNEL_OK")
</pallas_src>

<mosaic_0001>
module attributes {stable_mosaic.version = 11 : i64} {
  func.func @transformer_block_kernel(%arg0: i32, %arg1: i32, %arg2: memref<1x32x32xbf16, #tpu.memory_space<vmem>>, %arg3: memref<1x1x32xf32, #tpu.memory_space<vmem>>, %arg4: memref<1x4x16x32xbf16, #tpu.memory_space<vmem>>, %arg5: memref<1xf32, #tpu.memory_space<smem>>, %arg6: memref<1x32xf32, #tpu.memory_space<vmem>>, %arg7: memref<1x32xf32, #tpu.memory_space<vmem>>, %arg8: memref<4x32x8xbf16, #tpu.memory_space<vmem>>, %arg9: memref<4x1x8xf32, #tpu.memory_space<vmem>>, %arg10: memref<4x32x8xbf16, #tpu.memory_space<vmem>>, %arg11: memref<4x1x8xf32, #tpu.memory_space<vmem>>, %arg12: memref<4x32x8xbf16, #tpu.memory_space<vmem>>, %arg13: memref<4x1x8xf32, #tpu.memory_space<vmem>>, %arg14: memref<32x32xbf16, #tpu.memory_space<vmem>>, %arg15: memref<1x32xf32, #tpu.memory_space<vmem>>, %arg16: memref<1x32xf32, #tpu.memory_space<vmem>>, %arg17: memref<1x32xf32, #tpu.memory_space<vmem>>, %arg18: memref<32x64xbf16, #tpu.memory_space<vmem>>, %arg19: memref<1x64xf32, #tpu.memory_space<vmem>>, %arg20: memref<64x32xbf16, #tpu.memory_space<vmem>>, %arg21: memref<1x32xf32, #tpu.memory_space<vmem>>, %arg22: memref<1x16x32xbf16, #tpu.memory_space<vmem>>, %arg23: memref<4x32x8xbf16, #tpu.memory_space<vmem>>, %arg24: memref<4x32x8xbf16, #tpu.memory_space<vmem>>) attributes {dimension_semantics = [#tpu.dimension_semantics<parallel>, #tpu.dimension_semantics<arbitrary>], iteration_bounds = array<i64: 2, 2>, scalar_prefetch = 0 : i64, scratch_operands = 2 : i64, tpu.core_type = #tpu.core_type<tc>, window_params = [{transform_indices = @transform_0, window_bounds = array<i64: 1, 32, 32>}, {transform_indices = @transform_1, window_bounds = array<i64: 1, 1, 32>}, {transform_indices = @transform_2, window_bounds = array<i64: 1, 4, 16, 32>}, {transform_indices = @transform_3, window_bounds = array<i64: 1>}, {pipeline_mode = #tpu.pipeline_mode<synchronous>, transform_indices = @transform_4, window_bounds = array<i64: 1, 32>}, {pipeline_mode = #tpu.pipeline_mode<synchronous>, transform_indices = @transform_5, window_bounds = array<i64: 1, 32>}, {pipeline_mode = #tpu.pipeline_mode<synchronous>, transform_indices = @transform_6, window_bounds = array<i64: 4, 32, 8>}, {pipeline_mode = #tpu.pipeline_mode<synchronous>, transform_indices = @transform_7, window_bounds = array<i64: 4, 1, 8>}, {pipeline_mode = #tpu.pipeline_mode<synchronous>, transform_indices = @transform_8, window_bounds = array<i64: 4, 32, 8>}, {pipeline_mode = #tpu.pipeline_mode<synchronous>, transform_indices = @transform_9, window_bounds = array<i64: 4, 1, 8>}, {pipeline_mode = #tpu.pipeline_mode<synchronous>, transform_indices = @transform_10, window_bounds = array<i64: 4, 32, 8>}, {pipeline_mode = #tpu.pipeline_mode<synchronous>, transform_indices = @transform_11, window_bounds = array<i64: 4, 1, 8>}, {pipeline_mode = #tpu.pipeline_mode<synchronous>, transform_indices = @transform_12, window_bounds = array<i64: 32, 32>}, {pipeline_mode = #tpu.pipeline_mode<synchronous>, transform_indices = @transform_13, window_bounds = array<i64: 1, 32>}, {pipeline_mode = #tpu.pipeline_mode<synchronous>, transform_indices = @transform_14, window_bounds = array<i64: 1, 32>}, {pipeline_mode = #tpu.pipeline_mode<synchronous>, transform_indices = @transform_15, window_bounds = array<i64: 1, 32>}, {pipeline_mode = #tpu.pipeline_mode<synchronous>, transform_indices = @transform_16, window_bounds = array<i64: 32, 64>}, {pipeline_mode = #tpu.pipeline_mode<synchronous>, transform_indices = @transform_17, window_bounds = array<i64: 1, 64>}, {pipeline_mode = #tpu.pipeline_mode<synchronous>, transform_indices = @transform_18, window_bounds = array<i64: 64, 32>}, {pipeline_mode = #tpu.pipeline_mode<synchronous>, transform_indices = @transform_19, window_bounds = array<i64: 1, 32>}, {transform_indices = @transform_20, window_bounds = array<i64: 1, 16, 32>}]} {
    %c0_i32 = arith.constant 0 : i32
    %0 = arith.cmpi eq, %arg1, %c0_i32 : i32
    %1 = arith.extui %0 : i1 to i32
    %c0_i32_0 = arith.constant 0 : i32
    %2 = arith.cmpi ne, %1, %c0_i32_0 : i32
    scf.if %2 {
      %c0_85 = arith.constant 0 : index
      %c0_86 = arith.constant 0 : index
      %c0_87 = arith.constant 0 : index
      %165 = vector.load %arg2[%c0_85, %c0_86, %c0_87] : memref<1x32x32xbf16, #tpu.memory_space<vmem>>, vector<1x32x32xbf16>
      %166 = vector.shape_cast %165 : vector<1x32x32xbf16> to vector<32x32xbf16>
      %167 = arith.extf %166 : vector<32x32xbf16> to vector<32x32xf32>
      %c0_88 = arith.constant 0 : index
      %c0_89 = arith.constant 0 : index
      %168 = vector.load %arg6[%c0_88, %c0_89] : memref<1x32xf32, #tpu.memory_space<vmem>>, vector<1x32xf32>
      %c0_90 = arith.constant 0 : index
      %c0_91 = arith.constant 0 : index
      %169 = vector.load %arg7[%c0_90, %c0_91] : memref<1x32xf32, #tpu.memory_space<vmem>>, vector<1x32xf32>
      %cst_92 = arith.constant dense<0.000000e+00> : vector<32xf32>
      %170 = vector.multi_reduction <add>, %167, %cst_92 [1] : vector<32x32xf32> to vector<32xf32>
      %171 = vector.shape_cast %170 : vector<32xf32> to vector<32x1xf32>
      %cst_93 = arith.constant 3.200000e+01 : f32
      %172 = vector.broadcast %cst_93 : f32 to vector<32x1xf32>
      %173 = arith.divf %171, %172 : vector<32x1xf32>
      %174 = vector.broadcast %173 : vector<32x1xf32> to vector<32x32xf32>
      %175 = arith.subf %167, %174 : vector<32x32xf32>
      %176 = arith.mulf %175, %175 : vector<32x32xf32>
      %cst_94 = arith.constant dense<0.000000e+00> : vector<32xf32>
      %177 = vector.multi_reduction <add>, %176, %cst_94 [1] : vector<32x32xf32> to vector<32xf32>
      %178 = vector.shape_cast %177 : vector<32xf32> to vector<32x1xf32>
      %cst_95 = arith.constant 3.200000e+01 : f32
      %179 = vector.broadcast %cst_95 : f32 to vector<32x1xf32>
      %180 = arith.divf %178, %179 : vector<32x1xf32>
      %181 = vector.broadcast %173 : vector<32x1xf32> to vector<32x32xf32>
      %182 = arith.subf %167, %181 : vector<32x32xf32>
      %cst_96 = arith.constant 9.99999974E-6 : f32
      %183 = vector.broadcast %cst_96 : f32 to vector<32x1xf32>
      %184 = arith.addf %180, %183 : vector<32x1xf32>
      %185 = math.rsqrt %184 : vector<32x1xf32>
      %186 = vector.broadcast %185 : vector<32x1xf32> to vector<32x32xf32>
      %187 = arith.mulf %182, %186 : vector<32x32xf32>
      %188 = vector.broadcast %168 : vector<1x32xf32> to vector<32x32xf32>
      %189 = arith.mulf %187, %188 : vector<32x32xf32>
      %190 = vector.broadcast %169 : vector<1x32xf32> to vector<32x32xf32>
      %191 = arith.addf %189, %190 : vector<32x32xf32>
      %192 = arith.truncf %191 : vector<32x32xf32> to vector<32x32xbf16>
      %c0_97 = arith.constant 0 : index
      %c0_98 = arith.constant 0 : index
      %c0_99 = arith.constant 0 : index
      %193 = vector.load %arg10[%c0_97, %c0_98, %c0_99] : memref<4x32x8xbf16, #tpu.memory_space<vmem>>, vector<1x32x8xbf16>
      %194 = vector.shape_cast %193 : vector<1x32x8xbf16> to vector<32x8xbf16>
      %cst_100 = arith.constant dense<0.000000e+00> : vector<32x8xf32>
      %195 = tpu.matmul %192, %194, %cst_100 {dimension_numbers = #tpu.dot_dimension_numbers<[1], [0], [0], [1], [0, 0, 1, 1], [], []>} : vector<32x32xbf16>, vector<32x8xbf16>, vector<32x8xf32> -> vector<32x8xf32>
      %c0_101 = arith.constant 0 : index
      %c0_102 = arith.constant 0 : index
      %c0_103 = arith.constant 0 : index
      %196 = vector.load %arg11[%c0_101, %c0_102, %c0_103] : memref<4x1x8xf32, #tpu.memory_space<vmem>>, vector<1x1x8xf32>
      %197 = vector.shape_cast %196 : vector<1x1x8xf32> to vector<1x8xf32>
      %198 = vector.broadcast %197 : vector<1x8xf32> to vector<32x8xf32>
      %199 = arith.addf %195, %198 : vector<32x8xf32>
      %200 = arith.truncf %199 : vector<32x8xf32> to vector<32x8xbf16>
      %c0_104 = arith.constant 0 : index
      %c0_105 = arith.constant 0 : index
      %c0_106 = arith.constant 0 : index
      %201 = vector.load %arg23[%c0_104, %c0_105, %c0_106] : memref<4x32x8xbf16, #tpu.memory_space<vmem>>, vector<1x32x8xbf16>
      %202 = vector.shape_cast %201 : vector<1x32x8xbf16> to vector<32x8xbf16>
      %203 = vector.shape_cast %200 : vector<32x8xbf16> to vector<1x32x8xbf16>
      tpu.vector_store %arg23[%c0_104, %c0_105, %c0_106], %203 {strides = array<i32>} : memref<4x32x8xbf16, #tpu.memory_space<vmem>>, vector<1x32x8xbf16>,
      %c0_107 = arith.constant 0 : index
      %c0_108 = arith.constant 0 : index
      %c0_109 = arith.constant 0 : index
      %204 = vector.load %arg12[%c0_107, %c0_108, %c0_109] : memref<4x32x8xbf16, #tpu.memory_space<vmem>>, vector<1x32x8xbf16>
      %205 = vector.shape_cast %204 : vector<1x32x8xbf16> to vector<32x8xbf16>
      %cst_110 = arith.constant dense<0.000000e+00> : vector<32x8xf32>
      %206 = tpu.matmul %192, %205, %cst_110 {dimension_numbers = #tpu.dot_dimension_numbers<[1], [0], [0], [1], [0, 0, 1, 1], [], []>} : vector<32x32xbf16>, vector<32x8xbf16>, vector<32x8xf32> -> vector<32x8xf32>
      %c0_111 = arith.constant 0 : index
      %c0_112 = arith.constant 0 : index
      %c0_113 = arith.constant 0 : index
      %207 = vector.load %arg13[%c0_111, %c0_112, %c0_113] : memref<4x1x8xf32, #tpu.memory_space<vmem>>, vector<1x1x8xf32>
      %208 = vector.shape_cast %207 : vector<1x1x8xf32> to vector<1x8xf32>
      %209 = vector.broadcast %208 : vector<1x8xf32> to vector<32x8xf32>
      %210 = arith.addf %206, %209 : vector<32x8xf32>
      %211 = arith.truncf %210 : vector<32x8xf32> to vector<32x8xbf16>
      %c0_114 = arith.constant 0 : index
      %c0_115 = arith.constant 0 : index
      %c0_116 = arith.constant 0 : index
      %212 = vector.load %arg24[%c0_114, %c0_115, %c0_116] : memref<4x32x8xbf16, #tpu.memory_space<vmem>>, vector<1x32x8xbf16>
      %213 = vector.shape_cast %212 : vector<1x32x8xbf16> to vector<32x8xbf16>
      %214 = vector.shape_cast %211 : vector<32x8xbf16> to vector<1x32x8xbf16>
      tpu.vector_store %arg24[%c0_114, %c0_115, %c0_116], %214 {strides = array<i32>} : memref<4x32x8xbf16, #tpu.memory_space<vmem>>, vector<1x32x8xbf16>,
      %c1_117 = arith.constant 1 : index
      %c0_118 = arith.constant 0 : index
      %c0_119 = arith.constant 0 : index
      %215 = vector.load %arg10[%c1_117, %c0_118, %c0_119] : memref<4x32x8xbf16, #tpu.memory_space<vmem>>, vector<1x32x8xbf16>
      %216 = vector.shape_cast %215 : vector<1x32x8xbf16> to vector<32x8xbf16>
      %cst_120 = arith.constant dense<0.000000e+00> : vector<32x8xf32>
      %217 = tpu.matmul %192, %216, %cst_120 {dimension_numbers = #tpu.dot_dimension_numbers<[1], [0], [0], [1], [0, 0, 1, 1], [], []>} : vector<32x32xbf16>, vector<32x8xbf16>, vector<32x8xf32> -> vector<32x8xf32>
      %c1_121 = arith.constant 1 : index
      %c0_122 = arith.constant 0 : index
      %c0_123 = arith.constant 0 : index
      %218 = vector.load %arg11[%c1_121, %c0_122, %c0_123] : memref<4x1x8xf32, #tpu.memory_space<vmem>>, vector<1x1x8xf32>
      %219 = vector.shape_cast %218 : vector<1x1x8xf32> to vector<1x8xf32>
      %220 = vector.broadcast %219 : vector<1x8xf32> to vector<32x8xf32>
      %221 = arith.addf %217, %220 : vector<32x8xf32>
      %222 = arith.truncf %221 : vector<32x8xf32> to vector<32x8xbf16>
      %c1_124 = arith.constant 1 : index
      %c0_125 = arith.constant 0 : index
      %c0_126 = arith.constant 0 : index
      %223 = vector.load %arg23[%c1_124, %c0_125, %c0_126] : memref<4x32x8xbf16, #tpu.memory_space<vmem>>, vector<1x32x8xbf16>
      %224 = vector.shape_cast %223 : vector<1x32x8xbf16> to vector<32x8xbf16>
      %225 = vector.shape_cast %222 : vector<32x8xbf16> to vector<1x32x8xbf16>
      tpu.vector_store %arg23[%c1_124, %c0_125, %c0_126], %225 {strides = array<i32>} : memref<4x32x8xbf16, #tpu.memory_space<vmem>>, vector<1x32x8xbf16>,
      %c1_127 = arith.constant 1 : index
      %c0_128 = arith.constant 0 : index
      %c0_129 = arith.constant 0 : index
      %226 = vector.load %arg12[%c1_127, %c0_128, %c0_129] : memref<4x32x8xbf16, #tpu.memory_space<vmem>>, vector<1x32x8xbf16>
      %227 = vector.shape_cast %226 : vector<1x32x8xbf16> to vector<32x8xbf16>
      %cst_130 = arith.constant dense<0.000000e+00> : vector<32x8xf32>
      %228 = tpu.matmul %192, %227, %cst_130 {dimension_numbers = #tpu.dot_dimension_numbers<[1], [0], [0], [1], [0, 0, 1, 1], [], []>} : vector<32x32xbf16>, vector<32x8xbf16>, vector<32x8xf32> -> vector<32x8xf32>
      %c1_131 = arith.constant 1 : index
      %c0_132 = arith.constant 0 : index
      %c0_133 = arith.constant 0 : index
      %229 = vector.load %arg13[%c1_131, %c0_132, %c0_133] : memref<4x1x8xf32, #tpu.memory_space<vmem>>, vector<1x1x8xf32>
      %230 = vector.shape_cast %229 : vector<1x1x8xf32> to vector<1x8xf32>
      %231 = vector.broadcast %230 : vector<1x8xf32> to vector<32x8xf32>
      %232 = arith.addf %228, %231 : vector<32x8xf32>
      %233 = arith.truncf %232 : vector<32x8xf32> to vector<32x8xbf16>
      %c1_134 = arith.constant 1 : index
      %c0_135 = arith.constant 0 : index
      %c0_136 = arith.constant 0 : index
      %234 = vector.load %arg24[%c1_134, %c0_135, %c0_136] : memref<4x32x8xbf16, #tpu.memory_space<vmem>>, vector<1x32x8xbf16>
      %235 = vector.shape_cast %234 : vector<1x32x8xbf16> to vector<32x8xbf16>
      %236 = vector.shape_cast %233 : vector<32x8xbf16> to vector<1x32x8xbf16>
      tpu.vector_store %arg24[%c1_134, %c0_135, %c0_136], %236 {strides = array<i32>} : memref<4x32x8xbf16, #tpu.memory_space<vmem>>, vector<1x32x8xbf16>,
      %c2_137 = arith.constant 2 : index
      %c0_138 = arith.constant 0 : index
      %c0_139 = arith.constant 0 : index
      %237 = vector.load %arg10[%c2_137, %c0_138, %c0_139] : memref<4x32x8xbf16, #tpu.memory_space<vmem>>, vector<1x32x8xbf16>
      %238 = vector.shape_cast %237 : vector<1x32x8xbf16> to vector<32x8xbf16>
      %cst_140 = arith.constant dense<0.000000e+00> : vector<32x8xf32>
      %239 = tpu.matmul %192, %238, %cst_140 {dimension_numbers = #tpu.dot_dimension_numbers<[1], [0], [0], [1], [0, 0, 1, 1], [], []>} : vector<32x32xbf16>, vector<32x8xbf16>, vector<32x8xf32> -> vector<32x8xf32>
      %c2_141 = arith.constant 2 : index
      %c0_142 = arith.constant 0 : index
      %c0_143 = arith.constant 0 : index
      %240 = vector.load %arg11[%c2_141, %c0_142, %c0_143] : memref<4x1x8xf32, #tpu.memory_space<vmem>>, vector<1x1x8xf32>
      %241 = vector.shape_cast %240 : vector<1x1x8xf32> to vector<1x8xf32>
      %242 = vector.broadcast %241 : vector<1x8xf32> to vector<32x8xf32>
      %243 = arith.addf %239, %242 : vector<32x8xf32>
      %244 = arith.truncf %243 : vector<32x8xf32> to vector<32x8xbf16>
      %c2_144 = arith.constant 2 : index
      %c0_145 = arith.constant 0 : index
      %c0_146 = arith.constant 0 : index
      %245 = vector.load %arg23[%c2_144, %c0_145, %c0_146] : memref<4x32x8xbf16, #tpu.memory_space<vmem>>, vector<1x32x8xbf16>
      %246 = vector.shape_cast %245 : vector<1x32x8xbf16> to vector<32x8xbf16>
      %247 = vector.shape_cast %244 : vector<32x8xbf16> to vector<1x32x8xbf16>
      tpu.vector_store %arg23[%c2_144, %c0_145, %c0_146], %247 {strides = array<i32>} : memref<4x32x8xbf16, #tpu.memory_space<vmem>>, vector<1x32x8xbf16>,
      %c2_147 = arith.constant 2 : index
      %c0_148 = arith.constant 0 : index
      %c0_149 = arith.constant 0 : index
      %248 = vector.load %arg12[%c2_147, %c0_148, %c0_149] : memref<4x32x8xbf16, #tpu.memory_space<vmem>>, vector<1x32x8xbf16>
      %249 = vector.shape_cast %248 : vector<1x32x8xbf16> to vector<32x8xbf16>
      %cst_150 = arith.constant dense<0.000000e+00> : vector<32x8xf32>
      %250 = tpu.matmul %192, %249, %cst_150 {dimension_numbers = #tpu.dot_dimension_numbers<[1], [0], [0], [1], [0, 0, 1, 1], [], []>} : vector<32x32xbf16>, vector<32x8xbf16>, vector<32x8xf32> -> vector<32x8xf32>
      %c2_151 = arith.constant 2 : index
      %c0_152 = arith.constant 0 : index
      %c0_153 = arith.constant 0 : index
      %251 = vector.load %arg13[%c2_151, %c0_152, %c0_153] : memref<4x1x8xf32, #tpu.memory_space<vmem>>, vector<1x1x8xf32>
      %252 = vector.shape_cast %251 : vector<1x1x8xf32> to vector<1x8xf32>
      %253 = vector.broadcast %252 : vector<1x8xf32> to vector<32x8xf32>
      %254 = arith.addf %250, %253 : vector<32x8xf32>
      %255 = arith.truncf %254 : vector<32x8xf32> to vector<32x8xbf16>
      %c2_154 = arith.constant 2 : index
      %c0_155 = arith.constant 0 : index
      %c0_156 = arith.constant 0 : index
      %256 = vector.load %arg24[%c2_154, %c0_155, %c0_156] : memref<4x32x8xbf16, #tpu.memory_space<vmem>>, vector<1x32x8xbf16>
      %257 = vector.shape_cast %256 : vector<1x32x8xbf16> to vector<32x8xbf16>
      %258 = vector.shape_cast %255 : vector<32x8xbf16> to vector<1x32x8xbf16>
      tpu.vector_store %arg24[%c2_154, %c0_155, %c0_156], %258 {strides = array<i32>} : memref<4x32x8xbf16, #tpu.memory_space<vmem>>, vector<1x32x8xbf16>,
      %c3_157 = arith.constant 3 : index
      %c0_158 = arith.constant 0 : index
      %c0_159 = arith.constant 0 : index
      %259 = vector.load %arg10[%c3_157, %c0_158, %c0_159] : memref<4x32x8xbf16, #tpu.memory_space<vmem>>, vector<1x32x8xbf16>
      %260 = vector.shape_cast %259 : vector<1x32x8xbf16> to vector<32x8xbf16>
      %cst_160 = arith.constant dense<0.000000e+00> : vector<32x8xf32>
      %261 = tpu.matmul %192, %260, %cst_160 {dimension_numbers = #tpu.dot_dimension_numbers<[1], [0], [0], [1], [0, 0, 1, 1], [], []>} : vector<32x32xbf16>, vector<32x8xbf16>, vector<32x8xf32> -> vector<32x8xf32>
      %c3_161 = arith.constant 3 : index
      %c0_162 = arith.constant 0 : index
      %c0_163 = arith.constant 0 : index
      %262 = vector.load %arg11[%c3_161, %c0_162, %c0_163] : memref<4x1x8xf32, #tpu.memory_space<vmem>>, vector<1x1x8xf32>
      %263 = vector.shape_cast %262 : vector<1x1x8xf32> to vector<1x8xf32>
      %264 = vector.broadcast %263 : vector<1x8xf32> to vector<32x8xf32>
      %265 = arith.addf %261, %264 : vector<32x8xf32>
      %266 = arith.truncf %265 : vector<32x8xf32> to vector<32x8xbf16>
      %c3_164 = arith.constant 3 : index
      %c0_165 = arith.constant 0 : index
      %c0_166 = arith.constant 0 : index
      %267 = vector.load %arg23[%c3_164, %c0_165, %c0_166] : memref<4x32x8xbf16, #tpu.memory_space<vmem>>, vector<1x32x8xbf16>
      %268 = vector.shape_cast %267 : vector<1x32x8xbf16> to vector<32x8xbf16>
      %269 = vector.shape_cast %266 : vector<32x8xbf16> to vector<1x32x8xbf16>
      tpu.vector_store %arg23[%c3_164, %c0_165, %c0_166], %269 {strides = array<i32>} : memref<4x32x8xbf16, #tpu.memory_space<vmem>>, vector<1x32x8xbf16>,
      %c3_167 = arith.constant 3 : index
      %c0_168 = arith.constant 0 : index
      %c0_169 = arith.constant 0 : index
      %270 = vector.load %arg12[%c3_167, %c0_168, %c0_169] : memref<4x32x8xbf16, #tpu.memory_space<vmem>>, vector<1x32x8xbf16>
      %271 = vector.shape_cast %270 : vector<1x32x8xbf16> to vector<32x8xbf16>
      %cst_170 = arith.constant dense<0.000000e+00> : vector<32x8xf32>
      %272 = tpu.matmul %192, %271, %cst_170 {dimension_numbers = #tpu.dot_dimension_numbers<[1], [0], [0], [1], [0, 0, 1, 1], [], []>} : vector<32x32xbf16>, vector<32x8xbf16>, vector<32x8xf32> -> vector<32x8xf32>
      %c3_171 = arith.constant 3 : index
      %c0_172 = arith.constant 0 : index
      %c0_173 = arith.constant 0 : index
      %273 = vector.load %arg13[%c3_171, %c0_172, %c0_173] : memref<4x1x8xf32, #tpu.memory_space<vmem>>, vector<1x1x8xf32>
      %274 = vector.shape_cast %273 : vector<1x1x8xf32> to vector<1x8xf32>
      %275 = vector.broadcast %274 : vector<1x8xf32> to vector<32x8xf32>
      %276 = arith.addf %272, %275 : vector<32x8xf32>
      %277 = arith.truncf %276 : vector<32x8xf32> to vector<32x8xbf16>
      %c3_174 = arith.constant 3 : index
      %c0_175 = arith.constant 0 : index
      %c0_176 = arith.constant 0 : index
      %278 = vector.load %arg24[%c3_174, %c0_175, %c0_176] : memref<4x32x8xbf16, #tpu.memory_space<vmem>>, vector<1x32x8xbf16>
      %279 = vector.shape_cast %278 : vector<1x32x8xbf16> to vector<32x8xbf16>
      %280 = vector.shape_cast %277 : vector<32x8xbf16> to vector<1x32x8xbf16>
      tpu.vector_store %arg24[%c3_174, %c0_175, %c0_176], %280 {strides = array<i32>} : memref<4x32x8xbf16, #tpu.memory_space<vmem>>, vector<1x32x8xbf16>,
    } else {
    }
    %c16_i32 = arith.constant 16 : i32
    %3 = arith.muli %arg1, %c16_i32 : i32
    %4 = tpu.assume_multiple %3, 16 : i32
    %c0 = arith.constant 0 : index
    %5 = arith.index_cast %4 : i32 to index
    %c0_1 = arith.constant 0 : index
    %6 = vector.load %arg2[%c0, %5, %c0_1] : memref<1x32x32xbf16, #tpu.memory_space<vmem>>, vector<1x16x32xbf16>
    %7 = vector.shape_cast %6 : vector<1x16x32xbf16> to vector<16x32xbf16>
    %8 = arith.extf %7 : vector<16x32xbf16> to vector<16x32xf32>
    %c0_2 = arith.constant 0 : index
    %c0_3 = arith.constant 0 : index
    %9 = vector.load %arg6[%c0_2, %c0_3] : memref<1x32xf32, #tpu.memory_space<vmem>>, vector<1x32xf32>
    %c0_4 = arith.constant 0 : index
    %c0_5 = arith.constant 0 : index
    %10 = vector.load %arg7[%c0_4, %c0_5] : memref<1x32xf32, #tpu.memory_space<vmem>>, vector<1x32xf32>
    %cst = arith.constant dense<0.000000e+00> : vector<16xf32>
    %11 = vector.multi_reduction <add>, %8, %cst [1] : vector<16x32xf32> to vector<16xf32>
    %12 = vector.shape_cast %11 : vector<16xf32> to vector<16x1xf32>
    %cst_6 = arith.constant 3.200000e+01 : f32
    %13 = vector.broadcast %cst_6 : f32 to vector<16x1xf32>
    %14 = arith.divf %12, %13 : vector<16x1xf32>
    %15 = vector.broadcast %14 : vector<16x1xf32> to vector<16x32xf32>
    %16 = arith.subf %8, %15 : vector<16x32xf32>
    %17 = arith.mulf %16, %16 : vector<16x32xf32>
    %cst_7 = arith.constant dense<0.000000e+00> : vector<16xf32>
    %18 = vector.multi_reduction <add>, %17, %cst_7 [1] : vector<16x32xf32> to vector<16xf32>
    %19 = vector.shape_cast %18 : vector<16xf32> to vector<16x1xf32>
    %cst_8 = arith.constant 3.200000e+01 : f32
    %20 = vector.broadcast %cst_8 : f32 to vector<16x1xf32>
    %21 = arith.divf %19, %20 : vector<16x1xf32>
    %22 = vector.broadcast %14 : vector<16x1xf32> to vector<16x32xf32>
    %23 = arith.subf %8, %22 : vector<16x32xf32>
    %cst_9 = arith.constant 9.99999974E-6 : f32
    %24 = vector.broadcast %cst_9 : f32 to vector<16x1xf32>
    %25 = arith.addf %21, %24 : vector<16x1xf32>
    %26 = math.rsqrt %25 : vector<16x1xf32>
    %27 = vector.broadcast %26 : vector<16x1xf32> to vector<16x32xf32>
    %28 = arith.mulf %23, %27 : vector<16x32xf32>
    %29 = vector.broadcast %9 : vector<1x32xf32> to vector<16x32xf32>
    %30 = arith.mulf %28, %29 : vector<16x32xf32>
    %31 = vector.broadcast %10 : vector<1x32xf32> to vector<16x32xf32>
    %32 = arith.addf %30, %31 : vector<16x32xf32>
    %33 = arith.truncf %32 : vector<16x32xf32> to vector<16x32xbf16>
    %c0_10 = arith.constant 0 : index
    %c0_11 = arith.constant 0 : index
    %c0_12 = arith.constant 0 : index
    %34 = vector.load %arg8[%c0_10, %c0_11, %c0_12] : memref<4x32x8xbf16, #tpu.memory_space<vmem>>, vector<1x32x8xbf16>
    %35 = vector.shape_cast %34 : vector<1x32x8xbf16> to vector<32x8xbf16>
    %cst_13 = arith.constant dense<0.000000e+00> : vector<16x8xf32>
    %36 = tpu.matmul %33, %35, %cst_13 {dimension_numbers = #tpu.dot_dimension_numbers<[1], [0], [0], [1], [0, 0, 1, 1], [], []>} : vector<16x32xbf16>, vector<32x8xbf16>, vector<16x8xf32> -> vector<16x8xf32>
    %c0_14 = arith.constant 0 : index
    %c0_15 = arith.constant 0 : index
    %c0_16 = arith.constant 0 : index
    %37 = vector.load %arg9[%c0_14, %c0_15, %c0_16] : memref<4x1x8xf32, #tpu.memory_space<vmem>>, vector<1x1x8xf32>
    %38 = vector.shape_cast %37 : vector<1x1x8xf32> to vector<1x8xf32>
    %39 = vector.broadcast %38 : vector<1x8xf32> to vector<16x8xf32>
    %40 = arith.addf %36, %39 : vector<16x8xf32>
    %c1 = arith.constant 1 : index
    %c0_17 = arith.constant 0 : index
    %c0_18 = arith.constant 0 : index
    %41 = vector.load %arg8[%c1, %c0_17, %c0_18] : memref<4x32x8xbf16, #tpu.memory_space<vmem>>, vector<1x32x8xbf16>
    %42 = vector.shape_cast %41 : vector<1x32x8xbf16> to vector<32x8xbf16>
    %cst_19 = arith.constant dense<0.000000e+00> : vector<16x8xf32>
    %43 = tpu.matmul %33, %42, %cst_19 {dimension_numbers = #tpu.dot_dimension_numbers<[1], [0], [0], [1], [0, 0, 1, 1], [], []>} : vector<16x32xbf16>, vector<32x8xbf16>, vector<16x8xf32> -> vector<16x8xf32>
    %c1_20 = arith.constant 1 : index
    %c0_21 = arith.constant 0 : index
    %c0_22 = arith.constant 0 : index
    %44 = vector.load %arg9[%c1_20, %c0_21, %c0_22] : memref<4x1x8xf32, #tpu.memory_space<vmem>>, vector<1x1x8xf32>
    %45 = vector.shape_cast %44 : vector<1x1x8xf32> to vector<1x8xf32>
    %46 = vector.broadcast %45 : vector<1x8xf32> to vector<16x8xf32>
    %47 = arith.addf %43, %46 : vector<16x8xf32>
    %c2 = arith.constant 2 : index
    %c0_23 = arith.constant 0 : index
    %c0_24 = arith.constant 0 : index
    %48 = vector.load %arg8[%c2, %c0_23, %c0_24] : memref<4x32x8xbf16, #tpu.memory_space<vmem>>, vector<1x32x8xbf16>
    %49 = vector.shape_cast %48 : vector<1x32x8xbf16> to vector<32x8xbf16>
    %cst_25 = arith.constant dense<0.000000e+00> : vector<16x8xf32>
    %50 = tpu.matmul %33, %49, %cst_25 {dimension_numbers = #tpu.dot_dimension_numbers<[1], [0], [0], [1], [0, 0, 1, 1], [], []>} : vector<16x32xbf16>, vector<32x8xbf16>, vector<16x8xf32> -> vector<16x8xf32>
    %c2_26 = arith.constant 2 : index
    %c0_27 = arith.constant 0 : index
    %c0_28 = arith.constant 0 : index
    %51 = vector.load %arg9[%c2_26, %c0_27, %c0_28] : memref<4x1x8xf32, #tpu.memory_space<vmem>>, vector<1x1x8xf32>
    %52 = vector.shape_cast %51 : vector<1x1x8xf32> to vector<1x8xf32>
    %53 = vector.broadcast %52 : vector<1x8xf32> to vector<16x8xf32>
    %54 = arith.addf %50, %53 : vector<16x8xf32>
    %c3 = arith.constant 3 : index
    %c0_29 = arith.constant 0 : index
    %c0_30 = arith.constant 0 : index
    %55 = vector.load %arg8[%c3, %c0_29, %c0_30] : memref<4x32x8xbf16, #tpu.memory_space<vmem>>, vector<1x32x8xbf16>
    %56 = vector.shape_cast %55 : vector<1x32x8xbf16> to vector<32x8xbf16>
    %cst_31 = arith.constant dense<0.000000e+00> : vector<16x8xf32>
    %57 = tpu.matmul %33, %56, %cst_31 {dimension_numbers = #tpu.dot_dimension_numbers<[1], [0], [0], [1], [0, 0, 1, 1], [], []>} : vector<16x32xbf16>, vector<32x8xbf16>, vector<16x8xf32> -> vector<16x8xf32>
    %c3_32 = arith.constant 3 : index
    %c0_33 = arith.constant 0 : index
    %c0_34 = arith.constant 0 : index
    %58 = vector.load %arg9[%c3_32, %c0_33, %c0_34] : memref<4x1x8xf32, #tpu.memory_space<vmem>>, vector<1x1x8xf32>
    %59 = vector.shape_cast %58 : vector<1x1x8xf32> to vector<1x8xf32>
    %60 = vector.broadcast %59 : vector<1x8xf32> to vector<16x8xf32>
    %61 = arith.addf %57, %60 : vector<16x8xf32>
    %62 = vector.shape_cast %40 : vector<16x8xf32> to vector<1x16x8xf32>
    %63 = vector.shape_cast %47 : vector<16x8xf32> to vector<1x16x8xf32>
    %64 = vector.shape_cast %54 : vector<16x8xf32> to vector<1x16x8xf32>
    %65 = vector.shape_cast %61 : vector<16x8xf32> to vector<1x16x8xf32>
    %66 = tpu.concatenate %62, %63, %64, %65 in 0 : vector<1x16x8xf32>, vector<1x16x8xf32>, vector<1x16x8xf32>, vector<1x16x8xf32> -> vector<4x16x8xf32>
    %67 = arith.truncf %66 : vector<4x16x8xf32> to vector<4x16x8xbf16>
    %c0_35 = arith.constant 0 : index
    %c0_36 = arith.constant 0 : index
    %c0_37 = arith.constant 0 : index
    %68 = vector.load %arg23[%c0_35, %c0_36, %c0_37] : memref<4x32x8xbf16, #tpu.memory_space<vmem>>, vector<4x32x8xbf16>
    %c0_38 = arith.constant 0 : index
    %c0_39 = arith.constant 0 : index
    %c0_40 = arith.constant 0 : index
    %69 = vector.load %arg24[%c0_38, %c0_39, %c0_40] : memref<4x32x8xbf16, #tpu.memory_space<vmem>>, vector<4x32x8xbf16>
    "tpu.trace_start"() <{level = 10 : i32, message = "hqd,hkd->hqk"}> : () -> ()
    %cst_41 = arith.constant dense<0.000000e+00> : vector<4x16x32xf32>
    %70 = tpu.matmul %67, %68, %cst_41 {dimension_numbers = #tpu.dot_dimension_numbers<[2], [2], [1], [1], [0, 0, 0, 1, 1, 1], [0], [0]>} : vector<4x16x8xbf16>, vector<4x32x8xbf16>, vector<4x16x32xf32> -> vector<4x16x32xf32>
    "tpu.trace_stop"() : () -> ()
    %cst_42 = arith.constant 0.353553385 : f32
    %71 = vector.broadcast %cst_42 : f32 to vector<4x16x32xf32>
    %72 = arith.mulf %70, %71 : vector<4x16x32xf32>
    %c0_43 = arith.constant 0 : index
    %c0_44 = arith.constant 0 : index
    %c0_45 = arith.constant 0 : index
    %c0_46 = arith.constant 0 : index
    %73 = vector.load %arg4[%c0_43, %c0_44, %c0_45, %c0_46] : memref<1x4x16x32xbf16, #tpu.memory_space<vmem>>, vector<1x4x16x32xbf16>
    %74 = vector.shape_cast %73 : vector<1x4x16x32xbf16> to vector<4x16x32xbf16>
    %75 = arith.extf %74 : vector<4x16x32xbf16> to vector<4x16x32xf32>
    %c0_47 = arith.constant 0 : index
    %76 = memref.load %arg5[%c0_47] : memref<1xf32, #tpu.memory_space<smem>>
    %77 = vector.broadcast %76 : f32 to vector<4x16x32xf32>
    %78 = arith.mulf %75, %77 : vector<4x16x32xf32>
    %79 = arith.addf %72, %78 : vector<4x16x32xf32>
    %c0_48 = arith.constant 0 : index
    %c0_49 = arith.constant 0 : index
    %c0_50 = arith.constant 0 : index
    %80 = vector.load %arg3[%c0_48, %c0_49, %c0_50] : memref<1x1x32xf32, #tpu.memory_space<vmem>>, vector<1x1x32xf32>
    %81 = vector.broadcast %80 : vector<1x1x32xf32> to vector<4x16x32xf32>
    %82 = arith.addf %79, %81 : vector<4x16x32xf32>
    %cst_51 = arith.constant dense<0xFF800000> : vector<4x16xf32>
    %83 = vector.multi_reduction <maximumf>, %82, %cst_51 [2] : vector<4x16x32xf32> to vector<4x16xf32>
    %84 = vector.shape_cast %83 : vector<4x16xf32> to vector<4x16x1xf32>
    %85 = vector.broadcast %84 : vector<4x16x1xf32> to vector<4x16x32xf32>
    %86 = arith.subf %82, %85 : vector<4x16x32xf32>
    %87 = math.exp %86 : vector<4x16x32xf32>
    %cst_52 = arith.constant dense<0.000000e+00> : vector<4x16xf32>
    %88 = vector.multi_reduction <add>, %87, %cst_52 [2] : vector<4x16x32xf32> to vector<4x16xf32>
    %89 = vector.shape_cast %88 : vector<4x16xf32> to vector<4x16x1xf32>
    %90 = tpu.reciprocal %89 {approx = true} : vector<4x16x1xf32> -> vector<4x16x1xf32>
    %91 = vector.broadcast %90 : vector<4x16x1xf32> to vector<4x16x32xf32>
    %92 = arith.mulf %87, %91 : vector<4x16x32xf32>
    %93 = arith.truncf %92 : vector<4x16x32xf32> to vector<4x16x32xbf16>
    "tpu.trace_start"() <{level = 10 : i32, message = "hqk,hkd->hqd"}> : () -> ()
    %cst_53 = arith.constant dense<0.000000e+00> : vector<4x16x8xf32>
    %94 = tpu.matmul %93, %69, %cst_53 {dimension_numbers = #tpu.dot_dimension_numbers<[2], [1], [1], [2], [0, 0, 0, 1, 1, 2], [0], [0]>} : vector<4x16x32xbf16>, vector<4x32x8xbf16>, vector<4x16x8xf32> -> vector<4x16x8xf32>
    "tpu.trace_stop"() : () -> ()
    %95 = vector.extract_strided_slice %94 {offsets = [0, 0, 0], sizes = [1, 16, 8], strides = [1, 1, 1]} : vector<4x16x8xf32> to vector<1x16x8xf32>
    %96 = vector.shape_cast %95 : vector<1x16x8xf32> to vector<16x8xf32>
    %97 = vector.extract_strided_slice %94 {offsets = [1, 0, 0], sizes = [1, 16, 8], strides = [1, 1, 1]} : vector<4x16x8xf32> to vector<1x16x8xf32>
    %98 = vector.shape_cast %97 : vector<1x16x8xf32> to vector<16x8xf32>
    %99 = vector.extract_strided_slice %94 {offsets = [2, 0, 0], sizes = [1, 16, 8], strides = [1, 1, 1]} : vector<4x16x8xf32> to vector<1x16x8xf32>
    %100 = vector.shape_cast %99 : vector<1x16x8xf32> to vector<16x8xf32>
    %101 = vector.extract_strided_slice %94 {offsets = [3, 0, 0], sizes = [1, 16, 8], strides = [1, 1, 1]} : vector<4x16x8xf32> to vector<1x16x8xf32>
    %102 = vector.shape_cast %101 : vector<1x16x8xf32> to vector<16x8xf32>
    %103 = tpu.concatenate %96, %98, %100, %102 in 1 : vector<16x8xf32>, vector<16x8xf32>, vector<16x8xf32>, vector<16x8xf32> -> vector<16x32xf32>
    %104 = arith.truncf %103 : vector<16x32xf32> to vector<16x32xbf16>
    %c0_54 = arith.constant 0 : index
    %c0_55 = arith.constant 0 : index
    %105 = vector.load %arg14[%c0_54, %c0_55] : memref<32x32xbf16, #tpu.memory_space<vmem>>, vector<32x32xbf16>
    %cst_56 = arith.constant dense<0.000000e+00> : vector<16x32xf32>
    %106 = tpu.matmul %104, %105, %cst_56 {dimension_numbers = #tpu.dot_dimension_numbers<[1], [0], [0], [1], [0, 0, 1, 1], [], []>} : vector<16x32xbf16>, vector<32x32xbf16>, vector<16x32xf32> -> vector<16x32xf32>
    %c0_57 = arith.constant 0 : index
    %c0_58 = arith.constant 0 : index
    %107 = vector.load %arg15[%c0_57, %c0_58] : memref<1x32xf32, #tpu.memory_space<vmem>>, vector<1x32xf32>
    %108 = vector.broadcast %107 : vector<1x32xf32> to vector<16x32xf32>
    %109 = arith.addf %106, %108 : vector<16x32xf32>
    %110 = arith.addf %8, %109 : vector<16x32xf32>
    %c0_59 = arith.constant 0 : index
    %c0_60 = arith.constant 0 : index
    %111 = vector.load %arg16[%c0_59, %c0_60] : memref<1x32xf32, #tpu.memory_space<vmem>>, vector<1x32xf32>
    %c0_61 = arith.constant 0 : index
    %c0_62 = arith.constant 0 : index
    %112 = vector.load %arg17[%c0_61, %c0_62] : memref<1x32xf32, #tpu.memory_space<vmem>>, vector<1x32xf32>
    %cst_63 = arith.constant dense<0.000000e+00> : vector<16xf32>
    %113 = vector.multi_reduction <add>, %110, %cst_63 [1] : vector<16x32xf32> to vector<16xf32>
    %114 = vector.shape_cast %113 : vector<16xf32> to vector<16x1xf32>
    %cst_64 = arith.constant 3.200000e+01 : f32
    %115 = vector.broadcast %cst_64 : f32 to vector<16x1xf32>
    %116 = arith.divf %114, %115 : vector<16x1xf32>
    %117 = vector.broadcast %116 : vector<16x1xf32> to vector<16x32xf32>
    %118 = arith.subf %110, %117 : vector<16x32xf32>
    %119 = arith.mulf %118, %118 : vector<16x32xf32>
    %cst_65 = arith.constant dense<0.000000e+00> : vector<16xf32>
    %120 = vector.multi_reduction <add>, %119, %cst_65 [1] : vector<16x32xf32> to vector<16xf32>
    %121 = vector.shape_cast %120 : vector<16xf32> to vector<16x1xf32>
    %cst_66 = arith.constant 3.200000e+01 : f32
    %122 = vector.broadcast %cst_66 : f32 to vector<16x1xf32>
    %123 = arith.divf %121, %122 : vector<16x1xf32>
    %124 = vector.broadcast %116 : vector<16x1xf32> to vector<16x32xf32>
    %125 = arith.subf %110, %124 : vector<16x32xf32>
    %cst_67 = arith.constant 9.99999974E-6 : f32
    %126 = vector.broadcast %cst_67 : f32 to vector<16x1xf32>
    %127 = arith.addf %123, %126 : vector<16x1xf32>
    %128 = math.rsqrt %127 : vector<16x1xf32>
    %129 = vector.broadcast %128 : vector<16x1xf32> to vector<16x32xf32>
    %130 = arith.mulf %125, %129 : vector<16x32xf32>
    %131 = vector.broadcast %111 : vector<1x32xf32> to vector<16x32xf32>
    %132 = arith.mulf %130, %131 : vector<16x32xf32>
    %133 = vector.broadcast %112 : vector<1x32xf32> to vector<16x32xf32>
    %134 = arith.addf %132, %133 : vector<16x32xf32>
    %135 = arith.truncf %134 : vector<16x32xf32> to vector<16x32xbf16>
    %c0_68 = arith.constant 0 : index
    %c0_69 = arith.constant 0 : index
    %136 = vector.load %arg18[%c0_68, %c0_69] : memref<32x64xbf16, #tpu.memory_space<vmem>>, vector<32x64xbf16>
    %cst_70 = arith.constant dense<0.000000e+00> : vector<16x64xf32>
    %137 = tpu.matmul %135, %136, %cst_70 {dimension_numbers = #tpu.dot_dimension_numbers<[1], [0], [0], [1], [0, 0, 1, 1], [], []>} : vector<16x32xbf16>, vector<32x64xbf16>, vector<16x64xf32> -> vector<16x64xf32>
    %c0_71 = arith.constant 0 : index
    %c0_72 = arith.constant 0 : index
    %138 = vector.load %arg19[%c0_71, %c0_72] : memref<1x64xf32, #tpu.memory_space<vmem>>, vector<1x64xf32>
    %139 = vector.broadcast %138 : vector<1x64xf32> to vector<16x64xf32>
    %140 = arith.addf %137, %139 : vector<16x64xf32>
    %cst_73 = arith.constant 5.000000e-01 : f32
    %141 = vector.broadcast %cst_73 : f32 to vector<16x64xf32>
    %142 = arith.mulf %141, %140 : vector<16x64xf32>
    %cst_74 = arith.constant 4.471500e-02 : f32
    %143 = vector.broadcast %cst_74 : f32 to vector<16x64xf32>
    %144 = arith.mulf %143, %140 : vector<16x64xf32>
    %145 = arith.mulf %144, %140 : vector<16x64xf32>
    %146 = arith.mulf %145, %140 : vector<16x64xf32>
    %147 = arith.addf %140, %146 : vector<16x64xf32>
    %cst_75 = arith.constant 0.797884583 : f32
    %148 = vector.broadcast %cst_75 : f32 to vector<16x64xf32>
    %149 = arith.mulf %148, %147 : vector<16x64xf32>
    %150 = math.tanh %149 : vector<16x64xf32>
    %cst_76 = arith.constant 1.000000e+00 : f32
    %151 = vector.broadcast %cst_76 : f32 to vector<16x64xf32>
    %152 = arith.addf %151, %150 : vector<16x64xf32>
    %153 = arith.mulf %142, %152 : vector<16x64xf32>
    %154 = arith.truncf %153 : vector<16x64xf32> to vector<16x64xbf16>
    %c0_77 = arith.constant 0 : index
    %c0_78 = arith.constant 0 : index
    %155 = vector.load %arg20[%c0_77, %c0_78] : memref<64x32xbf16, #tpu.memory_space<vmem>>, vector<64x32xbf16>
    %cst_79 = arith.constant dense<0.000000e+00> : vector<16x32xf32>
    %156 = tpu.matmul %154, %155, %cst_79 {dimension_numbers = #tpu.dot_dimension_numbers<[1], [0], [0], [1], [0, 0, 1, 1], [], []>} : vector<16x64xbf16>, vector<64x32xbf16>, vector<16x32xf32> -> vector<16x32xf32>
    %c0_80 = arith.constant 0 : index
    %c0_81 = arith.constant 0 : index
    %157 = vector.load %arg21[%c0_80, %c0_81] : memref<1x32xf32, #tpu.memory_space<vmem>>, vector<1x32xf32>
    %158 = vector.broadcast %157 : vector<1x32xf32> to vector<16x32xf32>
    %159 = arith.addf %156, %158 : vector<16x32xf32>
    %160 = arith.addf %110, %159 : vector<16x32xf32>
    %161 = arith.truncf %160 : vector<16x32xf32> to vector<16x32xbf16>
    %c0_82 = arith.constant 0 : index
    %c0_83 = arith.constant 0 : index
    %c0_84 = arith.constant 0 : index
    %162 = vector.load %arg22[%c0_82, %c0_83, %c0_84] : memref<1x16x32xbf16, #tpu.memory_space<vmem>>, vector<1x16x32xbf16>
    %163 = vector.shape_cast %162 : vector<1x16x32xbf16> to vector<16x32xbf16>
    %164 = vector.shape_cast %161 : vector<16x32xbf16> to vector<1x16x32xbf16>
    tpu.vector_store %arg22[%c0_82, %c0_83, %c0_84], %164 {strides = array<i32>} : memref<1x16x32xbf16, #tpu.memory_space<vmem>>, vector<1x16x32xbf16>,
    return
  }
  func.func @transform_0(%arg0: i32, %arg1: i32) -> (i32, i32, i32) {
    %c0_i32 = arith.constant 0 : i32
    %c0_i32_0 = arith.constant 0 : i32
    %c0_i32_1 = arith.constant 0 : i32
    return %arg0, %c0_i32, %c0_i32_0 : i32, i32, i32
  }
  func.func @transform_1(%arg0: i32, %arg1: i32) -> (i32, i32, i32) {
    %c0_i32 = arith.constant 0 : i32
    %c0_i32_0 = arith.constant 0 : i32
    %c0_i32_1 = arith.constant 0 : i32
    return %arg0, %c0_i32, %c0_i32_0 : i32, i32, i32
  }
  func.func @transform_2(%arg0: i32, %arg1: i32) -> (i32, i32, i32, i32) {
    %c0_i32 = arith.constant 0 : i32
    %c0_i32_0 = arith.constant 0 : i32
    %c0_i32_1 = arith.constant 0 : i32
    return %arg0, %c0_i32, %arg1, %c0_i32_0 : i32, i32, i32, i32
  }
  func.func @transform_3(%arg0: i32, %arg1: i32) -> i32 {
    %c0_i32 = arith.constant 0 : i32
    %c0_i32_0 = arith.constant 0 : i32
    return %c0_i32 : i32
  }
  func.func @transform_4(%arg0: i32, %arg1: i32) -> (i32, i32) {
    %c0_i32 = arith.constant 0 : i32
    %c0_i32_0 = arith.constant 0 : i32
    %c0_i32_1 = arith.constant 0 : i32
    return %c0_i32, %c0_i32_0 : i32, i32
  }
  func.func @transform_5(%arg0: i32, %arg1: i32) -> (i32, i32) {
    %c0_i32 = arith.constant 0 : i32
    %c0_i32_0 = arith.constant 0 : i32
    %c0_i32_1 = arith.constant 0 : i32
    return %c0_i32, %c0_i32_0 : i32, i32
  }
  func.func @transform_6(%arg0: i32, %arg1: i32) -> (i32, i32, i32) {
    %c0_i32 = arith.constant 0 : i32
    %c0_i32_0 = arith.constant 0 : i32
    %c0_i32_1 = arith.constant 0 : i32
    %c0_i32_2 = arith.constant 0 : i32
    return %c0_i32, %c0_i32_0, %c0_i32_1 : i32, i32, i32
  }
  func.func @transform_7(%arg0: i32, %arg1: i32) -> (i32, i32, i32) {
    %c0_i32 = arith.constant 0 : i32
    %c0_i32_0 = arith.constant 0 : i32
    %c0_i32_1 = arith.constant 0 : i32
    %c0_i32_2 = arith.constant 0 : i32
    return %c0_i32, %c0_i32_0, %c0_i32_1 : i32, i32, i32
  }
  func.func @transform_8(%arg0: i32, %arg1: i32) -> (i32, i32, i32) {
    %c0_i32 = arith.constant 0 : i32
    %c0_i32_0 = arith.constant 0 : i32
    %c0_i32_1 = arith.constant 0 : i32
    %c0_i32_2 = arith.constant 0 : i32
    return %c0_i32, %c0_i32_0, %c0_i32_1 : i32, i32, i32
  }
  func.func @transform_9(%arg0: i32, %arg1: i32) -> (i32, i32, i32) {
    %c0_i32 = arith.constant 0 : i32
    %c0_i32_0 = arith.constant 0 : i32
    %c0_i32_1 = arith.constant 0 : i32
    %c0_i32_2 = arith.constant 0 : i32
    return %c0_i32, %c0_i32_0, %c0_i32_1 : i32, i32, i32
  }
  func.func @transform_10(%arg0: i32, %arg1: i32) -> (i32, i32, i32) {
    %c0_i32 = arith.constant 0 : i32
    %c0_i32_0 = arith.constant 0 : i32
    %c0_i32_1 = arith.constant 0 : i32
    %c0_i32_2 = arith.constant 0 : i32
    return %c0_i32, %c0_i32_0, %c0_i32_1 : i32, i32, i32
  }
  func.func @transform_11(%arg0: i32, %arg1: i32) -> (i32, i32, i32) {
    %c0_i32 = arith.constant 0 : i32
    %c0_i32_0 = arith.constant 0 : i32
    %c0_i32_1 = arith.constant 0 : i32
    %c0_i32_2 = arith.constant 0 : i32
    return %c0_i32, %c0_i32_0, %c0_i32_1 : i32, i32, i32
  }
  func.func @transform_12(%arg0: i32, %arg1: i32) -> (i32, i32) {
    %c0_i32 = arith.constant 0 : i32
    %c0_i32_0 = arith.constant 0 : i32
    %c0_i32_1 = arith.constant 0 : i32
    return %c0_i32, %c0_i32_0 : i32, i32
  }
  func.func @transform_13(%arg0: i32, %arg1: i32) -> (i32, i32) {
    %c0_i32 = arith.constant 0 : i32
    %c0_i32_0 = arith.constant 0 : i32
    %c0_i32_1 = arith.constant 0 : i32
    return %c0_i32, %c0_i32_0 : i32, i32
  }
  func.func @transform_14(%arg0: i32, %arg1: i32) -> (i32, i32) {
    %c0_i32 = arith.constant 0 : i32
    %c0_i32_0 = arith.constant 0 : i32
    %c0_i32_1 = arith.constant 0 : i32
    return %c0_i32, %c0_i32_0 : i32, i32
  }
  func.func @transform_15(%arg0: i32, %arg1: i32) -> (i32, i32) {
    %c0_i32 = arith.constant 0 : i32
    %c0_i32_0 = arith.constant 0 : i32
    %c0_i32_1 = arith.constant 0 : i32
    return %c0_i32, %c0_i32_0 : i32, i32
  }
  func.func @transform_16(%arg0: i32, %arg1: i32) -> (i32, i32) {
    %c0_i32 = arith.constant 0 : i32
    %c0_i32_0 = arith.constant 0 : i32
    %c0_i32_1 = arith.constant 0 : i32
    return %c0_i32, %c0_i32_0 : i32, i32
  }
  func.func @transform_17(%arg0: i32, %arg1: i32) -> (i32, i32) {
    %c0_i32 = arith.constant 0 : i32
    %c0_i32_0 = arith.constant 0 : i32
    %c0_i32_1 = arith.constant 0 : i32
    return %c0_i32, %c0_i32_0 : i32, i32
  }
  func.func @transform_18(%arg0: i32, %arg1: i32) -> (i32, i32) {
    %c0_i32 = arith.constant 0 : i32
    %c0_i32_0 = arith.constant 0 : i32
    %c0_i32_1 = arith.constant 0 : i32
    return %c0_i32, %c0_i32_0 : i32, i32
  }
  func.func @transform_19(%arg0: i32, %arg1: i32) -> (i32, i32) {
    %c0_i32 = arith.constant 0 : i32
    %c0_i32_0 = arith.constant 0 : i32
    %c0_i32_1 = arith.constant 0 : i32
    return %c0_i32, %c0_i32_0 : i32, i32
  }
  func.func @transform_20(%arg0: i32, %arg1: i32) -> (i32, i32, i32) {
    %c0_i32 = arith.constant 0 : i32
    %c0_i32_0 = arith.constant 0 : i32
    return %arg0, %arg1, %c0_i32 : i32, i32, i32
  }
}

</mosaic_0001>

<bundles_post_ra>
// kernel: tpu_custom_call.1
= control target key start
LH: loop header
LB: loop body
LE: loop exit
PB: predicated region body
PF: predicated region fallthrough
CT: control target
= control target key end

     0   :  { %s3617_s0 = inlined_call_operand.vmem [shape: bf16[2,32,32], index: 0, kind: input, shape index: {}]   ;;  %s3618_s1 = inlined_call_operand.vmem [shape: f32[2,1,32], index: 1, kind: input, shape index: {}]   ;;  %s3619_s2 = inlined_call_operand.vmem [shape: bf16[2,4,32,32], index: 2, kind: input, shape index: {}]   ;;  %s3620_s3 = inlined_call_operand.<no memory space> [shape: f32[1], index: 3, kind: input, shape index: {}]   ;;  %s3621_s4 = inlined_call_operand.vmem [shape: f32[1,32], index: 4, kind: input, shape index: {}]   ;;  %s3622_s5 = inlined_call_operand.vmem [shape: f32[1,32], index: 5, kind: input, shape index: {}]   ;;  %s3623_s6 = inlined_call_operand.vmem [shape: bf16[4,32,8], index: 6, kind: input, shape index: {}]   ;;  %s3624_s7 = inlined_call_operand.vmem [shape: f32[4,1,8], index: 7, kind: input, shape index: {}]   ;;  %s3625_s8 = inlined_call_operand.vmem [shape: bf16[4,32,8], index: 8, kind: input, shape index: {}]   ;;  %s3626_s9 = inlined_call_operand.vmem [shape: f32[4,1,8], index: 9, kind: input, shape index: {}]   ;;  %s3627_s10 = inlined_call_operand.vmem [shape: bf16[4,32,8], index: 10, kind: input, shape index: {}]   ;;  %s3628_s11 = inlined_call_operand.vmem [shape: f32[4,1,8], index: 11, kind: input, shape index: {}]   ;;  %s3629_s12 = inlined_call_operand.vmem [shape: bf16[32,32], index: 12, kind: input, shape index: {}]   ;;  %s3630_s13 = inlined_call_operand.vmem [shape: f32[1,32], index: 13, kind: input, shape index: {}]   ;;  %s3631_s14 = inlined_call_operand.vmem [shape: f32[1,32], index: 14, kind: input, shape index: {}]   ;;  %s3632_s15 = inlined_call_operand.vmem [shape: f32[1,32], index: 15, kind: input, shape index: {}]   ;;  %s3633_s16 = inlined_call_operand.vmem [shape: bf16[32,64], index: 16, kind: input, shape index: {}]   ;;  %s3634_s17 = inlined_call_operand.vmem [shape: f32[1,64], index: 17, kind: input, shape index: {}]   ;;  %s3635_s18 = inlined_call_operand.vmem [shape: bf16[64,32], index: 18, kind: input, shape index: {}]   ;;  %s3636_s19 = inlined_call_operand.vmem [shape: f32[1,32], index: 19, kind: input, shape index: {}]   ;;  %s3637_s20 = inlined_call_operand.hbm [shape: bf16[2,32,32], index: 20, kind: output, shape index: {}]  }
   0x1   :  { %3649 = sst [smem:[#allocation18_spill]] %s3617_s0 }
   0x2   :  { %3650 = sst [smem:[#allocation19_spill]] %s3618_s1 }
   0x3   :  { %3651 = sst [smem:[#allocation20_spill]] %s3619_s2 }
   0x4   :  { %3652 = sst [smem:[#allocation21_spill]] %s3620_s3 }
   0x5   :  { %3653 = sst [smem:[#allocation22_spill]] %s3621_s4 }
   0x6   :  { %3654 = sst [smem:[#allocation23_spill]] %s3622_s5 }
   0x7   :  { %3655 = sst [smem:[#allocation24_spill]] %s3634_s17 }
   0x8   :  { %3656 = sst [smem:[#allocation25_spill]] %s3635_s18 }
   0x9   :  { %3657 = sst [smem:[#allocation26_spill]] %s3636_s19 }
   0xa   :  { %3658 = sst [smem:[#allocation27_spill]] %s3637_s20 }
   0xb   :  { %s3659_s23 = sld [smem:[#allocation21_spill]] }
  0x11   :  { %25 = sst [smem:[#allocation4]] %s3659_s23 }
  0x12   :  { %26 = vsyncpa [#allocation7], 0 }
  0x13   :  { %28 = vsyncpa [#allocation7 + $0x1], 0  ;;  %s3106_s24 = smov 0   ;;  %s3108_s2 = smov 0  }
  0x14   :  { %s3110_s25 = smov 0   ;;  %s3112_s3 = smov 0  }
  0x15   :  { %s3114_s26 = smov 0   ;;  %s3116_s27 = smov 0  }
  0x16   :  { %s3118_s28 = smov 0   ;;  %s3120_s4 = smov 0  }
  0x17 LB: > { %3660 = sst [smem:[#allocation9_spill]] %s2961_s24  ;;  %s2353_s29 = sadd.s32 4294967295, %s2989_s4   ;;  %s2989_s4 = sphi %s3120_s4, %s34_s4   ;;  %s2985_s28 = sphi %s3118_s28, %s3693_s28   ;;  %s2981_s27 = sphi %s3116_s27, %s3692_s27   ;;  %s2977_s26 = sphi %s3114_s26, %s3691_s26   ;;  %s2973_s3 = sphi %s3112_s3, %s3690_s3   ;;  %s2969_s25 = sphi %s3110_s25, %s3689_s25   ;;  %s2965_s2 = sphi %s3108_s2, %s3695_s2   ;;  %s2961_s24 = sphi %s3106_s24, %s3694_s24  }
  0x18   : > { %3661 = sst [smem:[#allocation10_spill]] %s2969_s25  ;;  %s2354_s30 = sadd.s32 4294967294, %s2989_s4  }
  0x19   : > { %3662 = sst [smem:[#allocation11_spill]] %s2981_s27  ;;  %s43_s0 = sadd.s32 1, %s2981_s27 }
  0x1a   : > { %3663 = sst [smem:[#allocation12_spill]] %s2985_s28  ;;  %p44_p0 = scmp.ge.s32.totalorder %s43_s0, 2 }
  0x1b   : > { %s46_s21 = sadd.s32 1, %s2985_s28  ;;  %p114_p1 = scmp.ne.s32.totalorder %s2969_s25, %s2965_s2 }
  0x1c   : > { %p115_p2 = scmp.eq.s32.totalorder %s2989_s4, 0  ;;  %s3697_s0 = smov (%p44_p0, %s43_s0), 0 }
  0x1d   : > { %3664 = sst [smem:[#allocation13_spill]] %s3697_s0  ;;  %s3699_s21 = smov (!%p44_p0, %s46_s21), %s2985_s28 }
  0x1e   : > { %s103_s1 = ssub.s32 %s2981_s27, %s3697_s0  ;;  %p3158_p3 = por %p115_p2, %p114_p1 }
  0x1f   : > { %p48_p4 = scmp.ge.s32.totalorder %s3699_s21, 2  ;;  %p503_p5 = scmp.eq.s32.totalorder %s2353_s29, 3 }
  0x20   : > { %p508_p6 = scmp.ne.s32.totalorder %s2965_s2, %s2961_s24  ;;  %p509_p7 = scmp.eq.s32.totalorder %s2354_s30, 3 }
  0x21   : > { %s3701_s21 = smov (%p48_p4, %s3699_s21), 0  ;;  %p3166_p8 = por %p503_p5, %p114_p1 }
  0x22   : > { %3666 = sst [smem:[#allocation14_spill]] %s3701_s21  ;;  %p3170_p9 = por %p509_p7, %p508_p6 }
  0x23   : > { %s3667_s23 = scalar_select %p3166_p8, 1, 0 }
  0x24   : > { %s3669_s20 = scalar_select %p3170_p9, 1, 0 }
  0x25   : > { %3668 = sst [smem:[#allocation15_spill]] %s3667_s23  ;;  %s102_s0 = ssub.s32 %s2985_s28, %s3701_s21 }
  0x26   : > { %3670 = sst [smem:[#allocation16_spill]] %s3669_s20  ;;  %s104_s19 = sor.u32 %s103_s1, %s102_s0 }
  0x27   : > { %s107_s17 = sadd.s32 1, %s2969_s25  ;;  %p105_p10 = scmp.eq.s32.totalorder %s104_s19, 0 }
  0x28   : > { %p2356_p11 = scmp.ge.s32.totalorder %s2989_s4, 4 }
  0x29   : > { %s3178_s18 = scalar_select %p105_p10, %s2969_s25, %s107_s17  }
  0x2a   : > { %576 = sbr.rel (%p2356_p11) target bundleno = 61 (0x3d), region = 84 }
  0x2b   : > { %3671 = sst [smem:[#allocation17_spill]] %s3178_s18 }
  0x2f   : > { %593 = sbr.rel (!%p3158_p3) target bundleno = 61 (0x3d), region = 96  ;;  %s595_s29 = sand.u32 (%p3158_p3), 1, %s2969_s25  }
  0x30   : > { %s2358_s30 = sshll.u32 (%p3158_p3), %s2981_s27, 1  ;;  %s2357_s24 = sshll.u32 (%p3158_p3), %s595_s29, 5 }
  0x31   : > { %s2359_s23 = sshll.u32 (%p3158_p3), %s2985_s28, 4  ;;  %s3672_s19 = sld [smem:[#allocation20_spill]] (%p3158_p3) }
  0x32   : > { %s600_s20 = sadd.s32 (%p3158_p3), %s2359_s23, %s2358_s30  ;;  %s597_s18 = scalar_lea.vmem (%p3158_p3), [#allocation5], %s2357_s24 }
  0x33   : > { %s2360_s21 = sshll.u32 (%p3158_p3), %s600_s20, 2 }
  0x37   : > { %s602_s17 = scalar_lea.vmem %s3672_s19, %s2360_s21 }
  0x38   : > { %v619_v0 = vld [vmem:[%s602_s17] sm:$0xff]   ;;  %v623_v1 = vld [vmem:[%s602_s17 + $0x10] sm:$0xff]  }
  0x39   : > { %v627_v2 = vld [vmem:[%s602_s17 + $0x20] sm:$0xff]   ;;  %620 = vst [vmem:[%s597_s18] sm:$0xff] %v619_v0   ;;  %v631_v3 = vld [vmem:[%s602_s17 + $0x30] sm:$0xff]  }
  0x3a   : > { %624 = vst [vmem:[%s597_s18 + $0x8] sm:$0xff] %v623_v1  }
  0x3b   : > { %628 = vst [vmem:[%s597_s18 + $0x10] sm:$0xff] %v627_v2  }
  0x3c   : > { %632 = vst [vmem:[%s597_s18 + $0x18] sm:$0xff] %v631_v3  }
  0x3d PF: > { %p2361_p12 = scmp.ge.s32.totalorder %s2989_s4, 1  ;;  %p673_p13 = scmp.lt.s32.totalorder %s2989_s4, 5 }
  0x3f   : > { %p674_p0 = pnand %p2361_p12, %p673_p13 }
  0x40   : > { %s3192_s20 = sand.u32 (!%p674_p0), 1, %s2965_s2   ;;  %p745_p1 = scmp.lt.s32.totalorder (!%p674_p0), %s2977_s26, 1 }
  0x41   : > { %677 = sbr.rel (%p674_p0) target bundleno = 2375 (0x947), region = 137  ;;  %s2362_s24 = sshll.u32 (!%p674_p0), %s3192_s20, 5 }
  0x42   : > { %s2363_s21 = sshll.u32 (!%p674_p0), %s3192_s20, 3  ;;  %s3673_s30 = sld [smem:[#allocation19_spill]] (!%p674_p0) }
  0x43   : > { %s3674_s17 = sld [smem:[#allocation18_spill]] (!%p674_p0)  ;;  %s3210_s27 = scalar_lea.vmem (!%p674_p0), [#allocation5], %s2362_s24 }
  0x44   : > { %s3212_s25 = scalar_lea.vmem (!%p674_p0), [#allocation6], %s2363_s21  ;;  %p2366_p2 = scmp.ne.s32.totalorder (!%p674_p0), %s2973_s3, 0 }
  0x46   : > { %s3198_s22 = scalar_select %p745_p1, %s2977_s26, 1 }
  0x47   : > { %759 = sbr.rel (%p2366_p2) target bundleno = 553 (0x229), region = 145  ;;  %s3675_s19 = sld [smem:[#allocation22_spill]] (!%p2366_p2) }
  0x48   : > { %s2643_s18 = sshll.u32 %s3198_s22, 4  ;;  %s752_s0 = scalar_lea.vmem %s3673_s30, %s3198_s22 }
  0x49   : > { %s3208_s28 = scalar_lea.vmem %s3674_s17, %s2643_s18  ;;  %s3676_s5 = sld [smem:[#allocation23_spill]] (!%p2366_p2) }
  0x4c   : > { %v2720_v4 = vld [vmem:[%s3208_s28 + $0x8] sm:$0xff]   ;;  %vm770_vm0 = vcmask 261120   ;;  %v2693_v5 = vld [vmem:[%s3208_s28] sm:$0xff]   ;;  %v2991_v14 = vmov 32.0   ;;  %v2649_v43 = vld [vmem:[%s3625_s8 + $0x18] sm:$0xff]  ;;  %vm931_vm14 = vcmask 60416  }
  0x4d   : > { %v2698_v6 = vunpack.c.l.bf16 %v2720_v4  ;;  %v2694_v7 = vunpack.c.l.bf16 %v2693_v5  ;;  %v2699_v10 = vunpack.c.h.bf16 %v2720_v4  ;;  %v2695_v11 = vunpack.c.h.bf16 %v2693_v5  ;;  %v2645_v41 = vld [vmem:[%s3625_s8 + $0x8] sm:$0xff]  ;;  %v2651_v45 = vld [vmem:[%s3627_s10 + $0x18] sm:$0xff]  ;;  %1011 = vmatpush.bf16.msra.mxu2 %v2649_v43  ;;  %v2644_v49 = vld [vmem:[%s3625_s8] sm:$0xff] }
  0x4e   : > { %2812 = vrcp.f32 %v2991_v14  ;;  %v2647_v42 = vld [vmem:[%s3627_s10 + $0x8] sm:$0xff]  ;;  %914 = vmatpush.bf16.msra.mxu0 %v2645_v41  ;;  %1061 = vmatpush.bf16.msra.mxu3 %v2651_v45  ;;  %v2646_v50 = vld [vmem:[%s3627_s10] sm:$0xff]  ;;  %v2648_v52 = vld [vmem:[%s3625_s8 + $0x10] sm:$0xff] }
  0x4f   : > { %v777_v8 = vsel %vm770_vm0, %v2698_v6, 0.0  ;;  %v771_v9 = vsel %vm770_vm0, %v2694_v7, 0.0  ;;  %v780_v12 = vsel %vm770_vm0, %v2699_v10, 0.0  ;;  %v774_v13 = vsel %vm770_vm0, %v2695_v11, 0.0  ;;  %962 = vmatpush.bf16.msra.mxu1 %v2647_v42  ;;  %v2650_v53 = vld [vmem:[%s3627_s10 + $0x10] sm:$0xff]  ;;  %v2657_v59 = vld [vmem:[%s3625_s8 + $0x38] sm:$0xff] }
  0x50   : > { %778 = vadd.xlane.f32.xlu1 %v777_v8  ;;  %772 = vadd.xlane.f32.xlu0 %v771_v9  ;;  %v2659_v60 = vld [vmem:[%s3627_s10 + $0x38] sm:$0xff]  ;;  %v2653_v61 = vld [vmem:[%s3625_s8 + $0x28] sm:$0xff] }
  0x51   : > { %1012 = vmatpush.bf16.msra.mxu2 %v2648_v52  ;;  %v2655_v62 = vld [vmem:[%s3627_s10 + $0x28] sm:$0xff] }
  0x52   : > { %915 = vmatpush.bf16.msra.mxu0 %v2644_v49  ;;  %1062 = vmatpush.bf16.msra.mxu3 %v2650_v53 }
  0x53   : > { %963 = vmatpush.bf16.msra.mxu1 %v2646_v50 }
  0x54   : > { %v2813_v15 = vpop.eup %2812 }
  0x55   : > { %v784_v16 = vmul.f32 32.0, %v2813_v15  ;;  %vm788_vm1 = vweird.f32 %v2813_v15  ;;  %1211 = vmatpush.bf16.msrb.mxu2 %v2657_v59 }
  0x56   : > { %1261 = vmatpush.bf16.msrb.mxu3 %v2659_v60  ;;  %1111 = vmatpush.bf16.msrb.mxu0 %v2653_v61 }
  0x57   : > { %v785_v17 = vsub.f32 1.0, %v784_v16  ;;  %1161 = vmatpush.bf16.msrb.mxu1 %v2655_v62 }
  0x58   : > { %781 = vadd.xlane.f32.xlu1 %v780_v12  ;;  %775 = vadd.xlane.f32.xlu0 %v774_v13 }
  0x59   : > { %v786_v18 = vmul.f32 %v2813_v15, %v785_v17 }
  0x5b   : > { %v787_v19 = vadd.f32 %v2813_v15, %v786_v18  ;;  %v2656_v18 = vld [vmem:[%s3625_s8 + $0x30] sm:$0xff] }
  0x5c   : > { %1212 = vmatpush.bf16.msrb.mxu2 %v2656_v18 }
  0x5d   : > { %v789_v20 = vsel %vm788_vm1, %v2813_v15, %v787_v19  ;;  %v2658_v19 = vld [vmem:[%s3627_s10 + $0x30] sm:$0xff] }
  0x5e   : > { %1262 = vmatpush.bf16.msrb.mxu3 %v2658_v19 }
  0xc3   : > { %v779_v21 = vpop.xlane.xlu1 %778  ;;  %v773_v22 = vpop.xlane.xlu0 %772 }
  0xc4   : > { %v792_v23 = vmul.f32 %v789_v20, %v779_v21  ;;  %v790_v24 = vmul.f32 %v789_v20, %v773_v22  ;;  %v2654_v21 = vld [vmem:[%s3627_s10 + $0x20] sm:$0xff] }
  0xc5   : > { %1162 = vmatpush.bf16.msrb.mxu1 %v2654_v21 }
  0xc6   : > { %v3221_v25 = vsub.f32 %v2698_v6, %v792_v23  ;;  %v3223_v26 = vsub.f32 %v2694_v7, %v790_v24  ;;  %v2802_v24 = vld [vmem:[%s3675_s19] ss:$0 sm:$0xff] }
  0xc8   : > { %v800_v27 = vmul.f32 %v3221_v25, %v3221_v25  ;;  %v798_v28 = vmul.f32 %v3223_v26, %v3223_v26 }
  0xca   : > { %v808_v29 = vsel %vm770_vm0, %v800_v27, 0.0  ;;  %v802_v30 = vsel %vm770_vm0, %v798_v28, 0.0 }
  0xcb   : > { %v782_v31 = vpop.xlane.xlu1 %781  ;;  %809 = vadd.xlane.f32.xlu0 %v808_v29  ;;  %803 = vadd.xlane.f32.xlu2 %v802_v30  ;;  %v776_v32 = vpop.xlane.xlu0 %775 }
  0xcc   : > { %v793_v33 = vmul.f32 %v789_v20, %v782_v31  ;;  %v791_v34 = vmul.f32 %v789_v20, %v776_v32  ;;  %v2803_v32 = vld [vmem:[%s3676_s5] ss:$0 sm:$0xff] }
  0xce   : > { %v3231_v35 = vsub.f32 %v2699_v10, %v793_v33  ;;  %v3233_v36 = vsub.f32 %v2695_v11, %v791_v34 }
  0xd0   : > { %v801_v37 = vmul.f32 %v3231_v35, %v3231_v35  ;;  %v799_v38 = vmul.f32 %v3233_v36, %v3233_v36 }
  0xd2   : > { %v811_v39 = vsel %vm770_vm0, %v801_v37, 0.0  ;;  %v805_v40 = vsel %vm770_vm0, %v799_v38, 0.0 }
  0xd3   : > { %812 = vadd.xlane.f32.xlu1 %v811_v39  ;;  %806 = vadd.xlane.f32.xlu2 %v805_v40 }
 0x13e   : > { %v804_v44 = vpop.xlane.xlu2 %803  ;;  %v810_v47 = vpop.xlane.xlu0 %809 }
 0x13f   : > { %v814_v46 = vmul.f32 %v804_v44, %v789_v20  ;;  %v816_v51 = vmul.f32 %v810_v47, %v789_v20 }
 0x141   : > { %v818_v48 = vadd.f32 1e-05, %v814_v46  ;;  %v3265_v54 = vadd.f32 1e-05, %v816_v51 }
 0x143   : > { %2814 = vrsqrt.f32 %v818_v48  ;;  %vm828_vm3 = vweird.f32 %v818_v48  ;;  %vm848_vm10 = vweird.f32 %v3265_v54 }
 0x144   : > { %2816 = vrsqrt.f32 %v3265_v54 }
 0x146   : > { %v813_v55 = vpop.xlane.xlu1 %812  ;;  %v807_v56 = vpop.xlane.xlu2 %806 }
 0x147   : > { %v817_v57 = vmul.f32 %v813_v55, %v789_v20  ;;  %v815_v58 = vmul.f32 %v807_v56, %v789_v20  ;;  %v2652_v20 = vld [vmem:[%s3625_s8 + $0x20] sm:$0xff] }
 0x148   : > { %1112 = vmatpush.bf16.msrb.mxu0 %v2652_v20 }
 0x149   : > { %v2815_v63 = vpop.eup %2814  ;;  %v821_v0 = vadd.f32 1e-05, %v817_v57  ;;  %v819_v1 = vadd.f32 1e-05, %v815_v58  ;;  %v2806_v57 = vld [vmem:[%s3626_s9 + $0x1] ss:$0 sm:$0xff] }
 0x14a   : > { %v823_v2 = vmul.f32 %v2815_v63, %v818_v48  ;;  %v2817_v5 = vpop.eup %2816  ;;  %vm829_vm2 = vweird.f32 %v2815_v63  ;;  %v2807_v58 = vld [vmem:[%s3628_s11 + $0x1] ss:$0 sm:$0xff] }
 0x14b   : > { %2818 = vrsqrt.f32 %v821_v0  ;;  %v843_v11 = vmul.f32 %v2817_v5, %v3265_v54  ;;  %vm830_vm4 = vmor %vm828_vm3, %vm829_vm2  ;;  %vm838_vm6 = vweird.f32 %v819_v1  ;;  %vm858_vm8 = vweird.f32 %v821_v0 }
 0x14c   : > { %v824_v3 = vmul.f32 %v2815_v63, %v823_v2  ;;  %2820 = vrsqrt.f32 %v819_v1  ;;  %vm849_vm11 = vweird.f32 %v2817_v5 }
 0x14d   : > { %v844_v16 = vmul.f32 %v2817_v5, %v843_v11  ;;  %vm850_vm13 = vmor %vm848_vm10, %vm849_vm11 }
 0x14e   : > { %v825_v4 = vmul.f32 0.5, %v824_v3 }
 0x14f   : > { %v845_v28 = vmul.f32 0.5, %v844_v16 }
 0x150   : > { %v826_v6 = vsub.f32 1.5, %v825_v4 }
 0x151   : > { %v2819_v7 = vpop.eup %2818  ;;  %v846_v37 = vsub.f32 1.5, %v845_v28 }
 0x152   : > { %v2821_v8 = vpop.eup %2820  ;;  %v853_v9 = vmul.f32 %v2819_v7, %v821_v0  ;;  %v827_v10 = vmul.f32 %v2815_v63, %v826_v6  ;;  %vm859_vm9 = vweird.f32 %v2819_v7 }
 0x153   : > { %v833_v12 = vmul.f32 %v2821_v8, %v819_v1  ;;  %vm839_vm5 = vweird.f32 %v2821_v8  ;;  %vm860_vm12 = vmor %vm858_vm8, %vm859_vm9  ;;  %v847_v41 = vmul.f32 %v2817_v5, %v846_v37 }
 0x154   : > { %v854_v13 = vmul.f32 %v2819_v7, %v853_v9  ;;  %v831_v15 = vsel %vm830_vm4, %v2815_v63, %v827_v10  ;;  %vm840_vm7 = vmor %vm838_vm6, %vm839_vm5 }
 0x155   : > { %v834_v14 = vmul.f32 %v2821_v8, %v833_v12  ;;  %v862_v27 = vmul.f32 %v831_v15, %v3223_v26 }
 0x156   : > { %v855_v22 = vmul.f32 0.5, %v854_v13 }
 0x157   : > { %v835_v17 = vmul.f32 0.5, %v834_v14  ;;  %v869_v33 = vmul.f32 %v2802_v24, %v862_v27 }
 0x158   : > { %v856_v30 = vsub.f32 1.5, %v855_v22 }
 0x159   : > { %v836_v23 = vsub.f32 1.5, %v835_v17  ;;  %v876_v39 = vadd.f32 %v2803_v32, %v869_v33  ;;  %v2808_v33 = vld [vmem:[%s3626_s9 + $0x2] ss:$0 sm:$0xff] }
 0x15a   : > { %v857_v26 = vmul.f32 %v2819_v7, %v856_v30 }
 0x15b   : > { %v837_v29 = vmul.f32 %v2821_v8, %v836_v23 }
 0x15c   : > { %v861_v43 = vsel %vm860_vm12, %v2819_v7, %v857_v26 }
 0x15d   : > { %v841_v31 = vsel %vm840_vm7, %v2821_v8, %v837_v29  ;;  %v865_v44 = vmul.f32 %v861_v43, %v3231_v35  ;;  %v2805_v35 = vld [vmem:[%s3628_s11] ss:$0 sm:$0xff] }
 0x15e   : > { %v863_v34 = vmul.f32 %v841_v31, %v3233_v36  ;;  %v851_v36 = vsel %vm850_vm13, %v2817_v5, %v847_v41 }
 0x15f   : > { %v864_v45 = vmul.f32 %v851_v36, %v3221_v25  ;;  %v872_v46 = vmul.f32 %v2802_v24, %v865_v44  ;;  %v2804_v25 = vld [vmem:[%s3626_s9] ss:$0 sm:$0xff] }
 0x160   : > { %v870_v38 = vmul.f32 %v2802_v24, %v863_v34  ;;  %v2809_v34 = vld [vmem:[%s3628_s11 + $0x2] ss:$0 sm:$0xff] }
 0x161   : > { %v871_v47 = vmul.f32 %v2802_v24, %v864_v45  ;;  %v879_v48 = vadd.f32 %v2803_v32, %v872_v46 }
 0x162   : > { %v877_v40 = vadd.f32 %v2803_v32, %v870_v38 }
 0x163   : > { %v878_v49 = vadd.f32 %v2803_v32, %v871_v47  ;;  %v2810_v47 = vld [vmem:[%s3626_s9 + $0x3] ss:$0 sm:$0xff] }
 0x164   : > { %v880_v42 = vpack.c.bf16 %v877_v40, %v876_v39 }
 0x165   : > { %v881_v50 = vpack.c.bf16 %v879_v48, %v878_v49  ;;  %v2811_v48 = vld [vmem:[%s3628_s11 + $0x3] ss:$0 sm:$0xff] }
 0x166   : > { %2375 = vmatmul.msk.bf16.vlgmr.msra.gmra.mxu0 %vm770_vm0, %v880_v42  ;;  %2385 = vmatmul.msk.bf16.vlgmr.msra.gmra.mxu1 %vm770_vm0, %v880_v42 }
 0x167   : > { %2400 = vmatmul.msk.bf16.vlgmr.msra.gmra.mxu2 %vm770_vm0, %v880_v42  ;;  %2415 = vmatmul.msk.bf16.vlgmr.msra.gmra.mxu3 %vm770_vm0, %v880_v42 }
 0x176   : > { %2376 = vmatmul.msk.bf16.gmra.mxu0 %vm770_vm0, %v881_v50  ;;  %2386 = vmatmul.msk.bf16.gmra.mxu1 %vm770_vm0, %v881_v50 }
 0x177   : > { %2401 = vmatmul.msk.bf16.gmra.mxu2 %vm770_vm0, %v881_v50  ;;  %2416 = vmatmul.msk.bf16.gmra.mxu3 %vm770_vm0, %v881_v50 }
 0x186   : > { %2430 = vmatmul.msk.bf16.vlgmr.msrb.gmra.mxu0 %vm770_vm0, %v880_v42  ;;  %2445 = vmatmul.msk.bf16.vlgmr.msrb.gmra.mxu1 %vm770_vm0, %v880_v42 }
 0x187   : > { %2460 = vmatmul.msk.bf16.vlgmr.msrb.gmra.mxu2 %vm770_vm0, %v880_v42  ;;  %2475 = vmatmul.msk.bf16.vlgmr.msrb.gmra.mxu3 %vm770_vm0, %v880_v42 }
 0x196   : > { %2431 = vmatmul.msk.bf16.gmra.mxu0 %vm770_vm0, %v881_v50  ;;  %2446 = vmatmul.msk.bf16.gmra.mxu1 %vm770_vm0, %v881_v50 }
 0x197   : > { %2461 = vmatmul.msk.bf16.gmra.mxu2 %vm770_vm0, %v881_v50  ;;  %2476 = vmatmul.msk.bf16.gmra.mxu3 %vm770_vm0, %v881_v50 }
 0x1e3   : > { %v917_v51 = vpop.f32.mrf.mxu0  ;;  %v965_v52 = vpop.f32.mrf.mxu1 }
 0x1e4   : > { %v918_v53 = vadd.f32 %v2804_v25, %v917_v51  ;;  %v966_v54 = vadd.f32 %v2805_v35, %v965_v52 }
 0x1e6   : > { %v927_v55 = vpack.c.bf16 %v918_v53, %v918_v53  ;;  %v975_v56 = vpack.c.bf16 %v966_v54, %v966_v54 }
 0x1e8   : > { %932 = vst.msk [vmem:[#allocation2] sm:$0xf] %vm931_vm14, %v927_v55 }
 0x1e9   : > { %979 = vst.msk [vmem:[#allocation3] sm:$0xf] %vm931_vm14, %v975_v56 }
 0x1ea   : > { %v1014_v59 = vpop.f32.mrf.mxu2  ;;  %v1064_v60 = vpop.f32.mrf.mxu3 }
 0x1eb   : > { %v1015_v61 = vadd.f32 %v2806_v57, %v1014_v59  ;;  %v1065_v62 = vadd.f32 %v2807_v58, %v1064_v60  ;;  %v919_v63 = vpop.f32.mrf.mxu0  ;;  %v967_v0 = vpop.f32.mrf.mxu1 }
 0x1ec   : > { %v920_v1 = vadd.f32 %v2804_v25, %v919_v63  ;;  %v968_v2 = vadd.f32 %v2805_v35, %v967_v0 }
 0x1ed   : > { %v1024_v3 = vpack.c.bf16 %v1015_v61, %v1015_v61  ;;  %v1074_v4 = vpack.c.bf16 %v1065_v62, %v1065_v62 }
 0x1ee   : > { %v928_v5 = vpack.c.bf16 %v920_v1, %v920_v1  ;;  %v976_v6 = vpack.c.bf16 %v968_v2, %v968_v2 }
 0x1ef   : > { %1029 = vst.msk [vmem:[#allocation2 + $0x10] sm:$0xf] %vm931_vm14, %v1024_v3 }
 0x1f0   : > { %1079 = vst.msk [vmem:[#allocation3 + $0x10] sm:$0xf] %vm931_vm14, %v1074_v4 }
 0x1f1   : > { %933 = vst.msk [vmem:[#allocation2 + $0x4] sm:$0xf] %vm931_vm14, %v928_v5 }
 0x1f2   : > { %980 = vst.msk [vmem:[#allocation3 + $0x4] sm:$0xf] %vm931_vm14, %v976_v6  ;;  %v1016_v7 = vpop.f32.mrf.mxu2  ;;  %v1066_v8 = vpop.f32.mrf.mxu3 }
 0x1f3   : > { %v1017_v9 = vadd.f32 %v2806_v57, %v1016_v7  ;;  %v1067_v10 = vadd.f32 %v2807_v58, %v1066_v8  ;;  %v922_v11 = vpop.f32.mrf.mxu0  ;;  %v970_v12 = vpop.f32.mrf.mxu1 }
 0x1f4   : > { %v923_v13 = vadd.f32 %v2804_v25, %v922_v11  ;;  %v971_v14 = vadd.f32 %v2805_v35, %v970_v12 }
 0x1f5   : > { %v1025_v15 = vpack.c.bf16 %v1017_v9, %v1017_v9  ;;  %v1075_v16 = vpack.c.bf16 %v1067_v10, %v1067_v10 }
 0x1f6   : > { %v929_v17 = vpack.c.bf16 %v923_v13, %v923_v13  ;;  %v977_v18 = vpack.c.bf16 %v971_v14, %v971_v14 }
 0x1f7   : > { %1030 = vst.msk [vmem:[#allocation2 + $0x14] sm:$0xf] %vm931_vm14, %v1025_v15 }
 0x1f8   : > { %1080 = vst.msk [vmem:[#allocation3 + $0x14] sm:$0xf] %vm931_vm14, %v1075_v16 }
 0x1f9   : > { %934 = vst.msk [vmem:[#allocation2 + $0x8] sm:$0xf] %vm931_vm14, %v929_v17 }
 0x1fa   : > { %981 = vst.msk [vmem:[#allocation3 + $0x8] sm:$0xf] %vm931_vm14, %v977_v18  ;;  %v1019_v19 = vpop.f32.mrf.mxu2  ;;  %v1069_v20 = vpop.f32.mrf.mxu3 }
 0x1fb   : > { %v1020_v21 = vadd.f32 %v2806_v57, %v1019_v19  ;;  %v1070_v22 = vadd.f32 %v2807_v58, %v1069_v20  ;;  %v924_v23 = vpop.f32.mrf.mxu0  ;;  %v972_v24 = vpop.f32.mrf.mxu1 }
 0x1fc   : > { %v925_v27 = vadd.f32 %v2804_v25, %v924_v23  ;;  %v973_v28 = vadd.f32 %v2805_v35, %v972_v24 }
 0x1fd   : > { %v1026_v29 = vpack.c.bf16 %v1020_v21, %v1020_v21  ;;  %v1076_v30 = vpack.c.bf16 %v1070_v22, %v1070_v22 }
 0x1fe   : > { %v930_v31 = vpack.c.bf16 %v925_v27, %v925_v27  ;;  %v978_v32 = vpack.c.bf16 %v973_v28, %v973_v28 }
 0x1ff   : > { %1031 = vst.msk [vmem:[#allocation2 + $0x18] sm:$0xf] %vm931_vm14, %v1026_v29 }
 0x200   : > { %1081 = vst.msk [vmem:[#allocation3 + $0x18] sm:$0xf] %vm931_vm14, %v1076_v30 }
 0x201   : > { %935 = vst.msk [vmem:[#allocation2 + $0xc] sm:$0xf] %vm931_vm14, %v930_v31 }
 0x202   : > { %982 = vst.msk [vmem:[#allocation3 + $0xc] sm:$0xf] %vm931_vm14, %v978_v32  ;;  %v1021_v37 = vpop.f32.mrf.mxu2  ;;  %v1071_v38 = vpop.f32.mrf.mxu3 }
 0x203   : > { %v1022_v26 = vadd.f32 %v2806_v57, %v1021_v37  ;;  %v1072_v39 = vadd.f32 %v2807_v58, %v1071_v38  ;;  %v1114_v40 = vpop.f32.mrf.mxu0  ;;  %v1164_v41 = vpop.f32.mrf.mxu1 }
 0x204   : > { %v1115_v42 = vadd.f32 %v2808_v33, %v1114_v40  ;;  %v1165_v43 = vadd.f32 %v2809_v34, %v1164_v41 }
 0x205   : > { %v1027_v36 = vpack.c.bf16 %v1022_v26, %v1022_v26  ;;  %v1077_v44 = vpack.c.bf16 %v1072_v39, %v1072_v39 }
 0x206   : > { %v1124_v45 = vpack.c.bf16 %v1115_v42, %v1115_v42  ;;  %v1174_v46 = vpack.c.bf16 %v1165_v43, %v1165_v43 }
 0x207   : > { %1032 = vst.msk [vmem:[#allocation2 + $0x1c] sm:$0xf] %vm931_vm14, %v1027_v36 }
 0x208   : > { %1082 = vst.msk [vmem:[#allocation3 + $0x1c] sm:$0xf] %vm931_vm14, %v1077_v44 }
 0x209   : > { %1129 = vst.msk [vmem:[#allocation2 + $0x20] sm:$0xf] %vm931_vm14, %v1124_v45 }
 0x20a   : > { %1179 = vst.msk [vmem:[#allocation3 + $0x20] sm:$0xf] %vm931_vm14, %v1174_v46  ;;  %v1214_v49 = vpop.f32.mrf.mxu2  ;;  %v1264_v50 = vpop.f32.mrf.mxu3 }
 0x20b   : > { %v1215_v25 = vadd.f32 %v2810_v47, %v1214_v49  ;;  %v1265_v35 = vadd.f32 %v2811_v48, %v1264_v50  ;;  %v1116_v51 = vpop.f32.mrf.mxu0  ;;  %v1166_v52 = vpop.f32.mrf.mxu1 }
 0x20c   : > { %v1117_v53 = vadd.f32 %v2808_v33, %v1116_v51  ;;  %v1167_v54 = vadd.f32 %v2809_v34, %v1166_v52 }
 0x20d   : > { %v1224_v55 = vpack.c.bf16 %v1215_v25, %v1215_v25  ;;  %v1274_v56 = vpack.c.bf16 %v1265_v35, %v1265_v35 }
 0x20e   : > { %v1125_v57 = vpack.c.bf16 %v1117_v53, %v1117_v53  ;;  %v1175_v58 = vpack.c.bf16 %v1167_v54, %v1167_v54 }
 0x20f   : > { %1229 = vst.msk [vmem:[#allocation2 + $0x30] sm:$0xf] %vm931_vm14, %v1224_v55 }
 0x210   : > { %1279 = vst.msk [vmem:[#allocation3 + $0x30] sm:$0xf] %vm931_vm14, %v1274_v56 }
 0x211   : > { %1130 = vst.msk [vmem:[#allocation2 + $0x24] sm:$0xf] %vm931_vm14, %v1125_v57 }
 0x212   : > { %1180 = vst.msk [vmem:[#allocation3 + $0x24] sm:$0xf] %vm931_vm14, %v1175_v58  ;;  %v1216_v59 = vpop.f32.mrf.mxu2  ;;  %v1266_v60 = vpop.f32.mrf.mxu3 }
 0x213   : > { %v1217_v61 = vadd.f32 %v2810_v47, %v1216_v59  ;;  %v1267_v62 = vadd.f32 %v2811_v48, %v1266_v60  ;;  %v1119_v63 = vpop.f32.mrf.mxu0  ;;  %v1169_v0 = vpop.f32.mrf.mxu1 }
 0x214   : > { %v1120_v1 = vadd.f32 %v2808_v33, %v1119_v63  ;;  %v1170_v2 = vadd.f32 %v2809_v34, %v1169_v0 }
 0x215   : > { %v1225_v3 = vpack.c.bf16 %v1217_v61, %v1217_v61  ;;  %v1275_v4 = vpack.c.bf16 %v1267_v62, %v1267_v62 }
 0x216   : > { %v1126_v5 = vpack.c.bf16 %v1120_v1, %v1120_v1  ;;  %v1176_v6 = vpack.c.bf16 %v1170_v2, %v1170_v2 }
 0x217   : > { %1230 = vst.msk [vmem:[#allocation2 + $0x34] sm:$0xf] %vm931_vm14, %v1225_v3 }
 0x218   : > { %1280 = vst.msk [vmem:[#allocation3 + $0x34] sm:$0xf] %vm931_vm14, %v1275_v4 }
 0x219   : > { %1131 = vst.msk [vmem:[#allocation2 + $0x28] sm:$0xf] %vm931_vm14, %v1126_v5 }
 0x21a   : > { %1181 = vst.msk [vmem:[#allocation3 + $0x28] sm:$0xf] %vm931_vm14, %v1176_v6  ;;  %v1219_v7 = vpop.f32.mrf.mxu2  ;;  %v1269_v8 = vpop.f32.mrf.mxu3 }
 0x21b   : > { %v1220_v9 = vadd.f32 %v2810_v47, %v1219_v7  ;;  %v1270_v10 = vadd.f32 %v2811_v48, %v1269_v8  ;;  %v1121_v11 = vpop.f32.mrf.mxu0  ;;  %v1171_v12 = vpop.f32.mrf.mxu1 }
 0x21c   : > { %v1122_v13 = vadd.f32 %v2808_v33, %v1121_v11  ;;  %v1172_v14 = vadd.f32 %v2809_v34, %v1171_v12 }
 0x21d   : > { %v1226_v15 = vpack.c.bf16 %v1220_v9, %v1220_v9  ;;  %v1276_v16 = vpack.c.bf16 %v1270_v10, %v1270_v10 }
 0x21e   : > { %v1127_v17 = vpack.c.bf16 %v1122_v13, %v1122_v13  ;;  %v1177_v18 = vpack.c.bf16 %v1172_v14, %v1172_v14 }
 0x21f   : > { %1231 = vst.msk [vmem:[#allocation2 + $0x38] sm:$0xf] %vm931_vm14, %v1226_v15 }
 0x220   : > { %1281 = vst.msk [vmem:[#allocation3 + $0x38] sm:$0xf] %vm931_vm14, %v1276_v16 }
 0x221   : > { %1132 = vst.msk [vmem:[#allocation2 + $0x2c] sm:$0xf] %vm931_vm14, %v1127_v17 }
 0x222   : > { %1182 = vst.msk [vmem:[#allocation3 + $0x2c] sm:$0xf] %vm931_vm14, %v1177_v18  ;;  %v1221_v19 = vpop.f32.mrf.mxu2  ;;  %v1271_v20 = vpop.f32.mrf.mxu3 }
 0x223   : > { %v1222_v21 = vadd.f32 %v2810_v47, %v1221_v19  ;;  %v1272_v22 = vadd.f32 %v2811_v48, %v1271_v20 }
 0x225   : > { %v1227_v23 = vpack.c.bf16 %v1222_v21, %v1222_v21  ;;  %v1277_v24 = vpack.c.bf16 %v1272_v22, %v1272_v22 }
 0x227   : > { %1232 = vst.msk [vmem:[#allocation2 + $0x3c] sm:$0xf] %vm931_vm14, %v1227_v23 }
 0x228   : > { %1282 = vst.msk [vmem:[#allocation3 + $0x3c] sm:$0xf] %vm931_vm14, %v1277_v24 }
 0x229 PF: > { %s2477_s17 = sshll.u32 %s2973_s3, 4  ;;  %vm1294_vm15 = vcmask 261120   ;;  %v2992_v32 = vmov 32.0   ;;  %v2661_v49 = vld [vmem:[%s3623_s6 + $0x8] sm:$0xff]  ;;  %v2663_v50 = vld [vmem:[%s3623_s6 + $0x18] sm:$0xff]  ;;  %v2660_v52 = vld [vmem:[%s3623_s6] sm:$0xff] }
 0x22a   : > { %s1284_s24 = sshra.s32 %s2477_s17, 3  ;;  %2849 = vrcp.f32 %v2992_v32  ;;  %v2665_v25 = vld [vmem:[%s3623_s6 + $0x28] sm:$0xff]  ;;  %v2667_v35 = vld [vmem:[%s3623_s6 + $0x38] sm:$0xff]  ;;  %1386 = vmatpush.bf16.msra.mxu0 %v2661_v49  ;;  %1422 = vmatpush.bf16.msra.mxu1 %v2663_v50  ;;  %v2662_v53 = vld [vmem:[%s3623_s6 + $0x10] sm:$0xff]  ;;  %s3678_s5 = sld [smem:[#allocation23_spill]]  ;;  %vm1557_vm7 = vcmask 64512  }
 0x22b   : > { %s2478_s21 = sshll.u32 %s1284_s24, 2  ;;  %1458 = vmatpush.bf16.msra.mxu2 %v2665_v25  ;;  %1494 = vmatpush.bf16.msra.mxu3 %v2667_v35  ;;  %v2664_v55 = vld [vmem:[%s3623_s6 + $0x20] sm:$0xff]  ;;  %v2666_v56 = vld [vmem:[%s3623_s6 + $0x30] sm:$0xff]  ;;  %v2669_v20 = vld [vmem:[#allocation2 + $0x8] sm:$0xff]  ;;  %s2994_s22 = smov 16   ;;  %vm2007_vm8 = vcmask 130048  }
 0x22c   : > { %s1287_s18 = scalar_lea.vmem %s3208_s28, %s2478_s21  ;;  %s3677_s21 = sld [smem:[#allocation22_spill]]  ;;  %v2671_v21 = vld [vmem:[#allocation2 + $0x18] sm:$0xff]  ;;  %v1565_v22 = vsel %vm1557_vm7, %v2669_v20, 0  ;;  %v2673_v24 = vld [vmem:[#allocation2 + $0x28] sm:$0xff]  ;;  %v2668_v32 = vld [vmem:[#allocation2] sm:$0xff]  ;;  %vm2010_vm9 = vcmask 195584  }
 0x22d   : > { %v2701_v27 = vld [vmem:[%s1287_s18] sm:$0xff]   ;;  %v1603_v23 = vsel %vm1557_vm7, %v2671_v21, 0  ;;  %s1719_s18 = sld [smem:[#allocation4]]  ;;  %v2721_v21 = vld [vmem:[%s3210_s27 + $0x8] sm:$0xff]   ;;  %s2638_s24 = sshll.u32 %s2973_s3, 1 }
 0x22e   : > { %v3378_v28 = vunpack.c.l.bf16 %v2701_v27  ;;  %v3382_v30 = vunpack.c.h.bf16 %v2701_v27  ;;  %1387 = vmatpush.bf16.msra.mxu0 %v2660_v52  ;;  %1423 = vmatpush.bf16.msra.mxu1 %v2662_v53  ;;  %v2675_v27 = vld [vmem:[#allocation2 + $0x38] sm:$0xff]  ;;  %v2841_v49 = vld [vmem:[%s3624_s7 + $0x2] ss:$0 sm:$0xff]  ;;  %v2842_v50 = vld [vmem:[%s3624_s7 + $0x3] ss:$0 sm:$0xff]  ;;  %s3680_s17 = sld [smem:[#allocation25_spill]] }
 0x22f   : > { %1459 = vmatpush.bf16.msra.mxu2 %v2664_v55  ;;  %1495 = vmatpush.bf16.msra.mxu3 %v2666_v56  ;;  %s3682_s19 = sld [smem:[#allocation26_spill]]  ;;  %s2242_s3 = sshll.u32 %s3212_s25, 4  ;;  %s2243_s3 = int_to_ptr.vmem [resolvable:$true] %s2242_s3 }
 0x230   : > { %v1295_v29 = vsel %vm1294_vm15, %v3378_v28, 0.0  ;;  %v1298_v31 = vsel %vm1294_vm15, %v3382_v30, 0.0  ;;  %v2850_v33 = vpop.eup %2849  ;;  %v2838_v15 = vld [vmem:[%s3678_s5] ss:$0 sm:$0xff]  ;;  %s2228_s30 = scalar_lea.sflag [#allocation7], %s3192_s20 }
 0x231   : > { %1296 = vadd.xlane.f32.xlu0 %v1295_v29  ;;  %v1302_v34 = vmul.f32 32.0, %v2850_v33  ;;  %vm1306_vm0 = vweird.f32 %v2850_v33  ;;  %v1641_v29 = vsel %vm1557_vm7, %v2673_v24, 0  ;;  %v2711_v24 = vunpack.c.h.bf16 %v2721_v21 }
 0x232   : > { %v2837_v10 = vld [vmem:[%s3677_s21] ss:$0 sm:$0xff]  ;;  %1573 = vmatpush.bf16.xpose.msrb.mxu0 %v1565_v22  ;;  %1611 = vmatpush.bf16.xpose.msrb.mxu1 %v1603_v23  ;;  %s2639_s21 = sshll.u32 %s2977_s26, 2 }
 0x233   : > { %v1303_v37 = vsub.f32 1.0, %v1302_v34  ;;  %1649 = vmatpush.bf16.xpose.msrb.mxu2 %v1641_v29  ;;  %v1562_v34 = vsel %vm1557_vm7, %v2668_v32, 0  ;;  %v1720_v20 = vstv %s1719_s18  ;;  %s2239_s18 = sadd.s32 %s2639_s21, %s2638_s24 }
 0x234   : > { %s2640_s28 = sshll.u32 %s2239_s18, 2 }
 0x235   : > { %v1304_v38 = vmul.f32 %v2850_v33, %v1303_v37 }
 0x237   : > { %v1305_v26 = vadd.f32 %v2850_v33, %v1304_v38  ;;  %v2672_v38 = vld [vmem:[#allocation2 + $0x20] sm:$0xff] }
 0x239   : > { %1299 = vadd.xlane.f32.xlu0 %v1298_v31  ;;  %v3386_v39 = vsel %vm1306_vm0, %v2850_v33, %v1305_v26  ;;  %v1679_v31 = vsel %vm1557_vm7, %v2675_v27, 0  ;;  %v2670_v33 = vld [vmem:[#allocation2 + $0x10] sm:$0xff] }
 0x23a   : > { %1687 = vmatpush.bf16.xpose.msrb.mxu3 %v1679_v31  ;;  %v1600_v37 = vsel %vm1557_vm7, %v2670_v33, 0  ;;  %1574 = vmatpush.bf16.xpose.msrb.mxu0 %v1562_v34  ;;  %v2674_v26 = vld [vmem:[#allocation2 + $0x30] sm:$0xff]  ;;  %v2705_v34 = vld [vmem:[%s3210_s27] sm:$0xff]  }
 0x23b   : > { %1612 = vmatpush.bf16.xpose.msrb.mxu1 %v1600_v37 }
 0x2a4   : > { %v1297_v40 = vpop.xlane.xlu0 %1296 }
 0x2a5   : > { %v1308_v41 = vmul.f32 %v3386_v39, %v1297_v40  ;;  %v1638_v40 = vsel %vm1557_vm7, %v2672_v38, 0 }
 0x2a6   : > { %1650 = vmatpush.bf16.xpose.msrb.mxu2 %v1638_v40 }
 0x2a7   : > { %v1310_v42 = vsub.f32 %v3378_v28, %v1308_v41  ;;  %v1676_v41 = vsel %vm1557_vm7, %v2674_v26, 0  ;;  %v2843_v26 = vld [vmem:[%s752_s0] ss:$0 sm:$0xff]  ;;  %s2995_s0 = smov 8  }
 0x2a8   : > { %1688 = vmatpush.bf16.xpose.msrb.mxu3 %v1676_v41 }
 0x2a9   : > { %v1312_v43 = vmul.f32 %v1310_v42, %v1310_v42 }
 0x2ab   : > { %v1314_v36 = vsel %vm1294_vm15, %v1312_v43, 0.0 }
 0x2ac   : > { %1315 = vadd.xlane.f32.xlu1 %v1314_v36  ;;  %v1300_v44 = vpop.xlane.xlu0 %1299  ;;  %v2839_v36 = vld [vmem:[%s3624_s7] ss:$0 sm:$0xff] }
 0x2ad   : > { %v1309_v45 = vmul.f32 %v3386_v39, %v1300_v44  ;;  %v2840_v44 = vld [vmem:[%s3624_s7 + $0x1] ss:$0 sm:$0xff] }
 0x2af   : > { %v1311_v46 = vsub.f32 %v3382_v30, %v1309_v45 }
 0x2b1   : > { %v1313_v47 = vmul.f32 %v1311_v46, %v1311_v46 }
 0x2b3   : > { %v1317_v48 = vsel %vm1294_vm15, %v1313_v47, 0.0 }
 0x2b4   : > { %1318 = vadd.xlane.f32.xlu1 %v1317_v48 }
 0x31f   : > { %v1316_v51 = vpop.xlane.xlu1 %1315 }
 0x320   : > { %v1320_v54 = vmul.f32 %v1316_v51, %v3386_v39 }
 0x322   : > { %v1322_v57 = vadd.f32 1e-05, %v1320_v54 }
 0x324   : > { %2851 = vrsqrt.f32 %v1322_v57  ;;  %vm1330_vm2 = vweird.f32 %v1322_v57 }
 0x327   : > { %v1319_v58 = vpop.xlane.xlu1 %1318 }
 0x328   : > { %v1321_v59 = vmul.f32 %v1319_v58, %v3386_v39 }
 0x32a   : > { %v2852_v60 = vpop.eup %2851  ;;  %v1323_v61 = vadd.f32 1e-05, %v1321_v59 }
 0x32b   : > { %v1325_v62 = vmul.f32 %v2852_v60, %v1322_v57  ;;  %vm1331_vm1 = vweird.f32 %v2852_v60 }
 0x32c   : > { %2853 = vrsqrt.f32 %v1323_v61  ;;  %vm1332_vm3 = vmor %vm1330_vm2, %vm1331_vm1  ;;  %vm1340_vm5 = vweird.f32 %v1323_v61  ;;  %vm2224_vm1 = vcmask 257024  }
 0x32d   : > { %v1326_v63 = vmul.f32 %v2852_v60, %v1325_v62 }
 0x32f   : > { %v1327_v0 = vmul.f32 0.5, %v1326_v63 }
 0x331   : > { %v1328_v1 = vsub.f32 1.5, %v1327_v0 }
 0x332   : > { %v2854_v2 = vpop.eup %2853 }
 0x333   : > { %v1329_v3 = vmul.f32 %v2852_v60, %v1328_v1  ;;  %v1335_v4 = vmul.f32 %v2854_v2, %v1323_v61  ;;  %vm1341_vm4 = vweird.f32 %v2854_v2 }
 0x334   : > { %vm1342_vm6 = vmor %vm1340_vm5, %vm1341_vm4 }
 0x335   : > { %v1336_v5 = vmul.f32 %v2854_v2, %v1335_v4  ;;  %v1333_v6 = vsel %vm1332_vm3, %v2852_v60, %v1329_v3 }
 0x336   : > { %v1344_v9 = vmul.f32 %v1333_v6, %v1310_v42 }
 0x337   : > { %v1337_v7 = vmul.f32 0.5, %v1336_v5 }
 0x338   : > { %v1349_v14 = vmul.f32 %v2837_v10, %v1344_v9 }
 0x339   : > { %v1338_v8 = vsub.f32 1.5, %v1337_v7 }
 0x33a   : > { %v1354_v17 = vadd.f32 %v2838_v15, %v1349_v14 }
 0x33b   : > { %v1339_v11 = vmul.f32 %v2854_v2, %v1338_v8 }
 0x33d   : > { %v1343_v12 = vsel %vm1342_vm6, %v2854_v2, %v1339_v11 }
 0x33e   : > { %v1345_v13 = vmul.f32 %v1343_v12, %v1311_v46 }
 0x340   : > { %v1350_v16 = vmul.f32 %v2837_v10, %v1345_v13 }
 0x342   : > { %v1355_v18 = vadd.f32 %v2838_v15, %v1350_v16  ;;  %v2722_v16 = vld [vmem:[%s3210_s27 + $0x10] sm:$0xff]  }
 0x343   : > { %v2715_v41 = vunpack.c.h.bf16 %v2722_v16 }
 0x344   : > { %v1356_v19 = vpack.c.bf16 %v1355_v18, %v1354_v17  ;;  %v2723_v17 = vld [vmem:[%s3210_s27 + $0x18] sm:$0xff]   ;;  %v2714_v18 = vunpack.c.l.bf16 %v2722_v16  ;;  %s2993_s27 = smov 24  }
 0x345   : > { %v2719_v40 = vunpack.c.h.bf16 %v2723_v17 }
 0x346   : > { %2487 = vmatmul.msk.bf16.vlgmr.msra.gmra.mxu0 %vm1294_vm15, %v1356_v19  ;;  %2501 = vmatmul.msk.bf16.vlgmr.msra.gmra.mxu1 %vm1294_vm15, %v1356_v19  ;;  %v1725_v22 = vmul.f32 %v2714_v18, %v1720_v20 }
 0x347   : > { %2515 = vmatmul.msk.bf16.vlgmr.msra.gmra.mxu2 %vm1294_vm15, %v1356_v19  ;;  %2529 = vmatmul.msk.bf16.vlgmr.msra.gmra.mxu3 %vm1294_vm15, %v1356_v19  ;;  %v2718_v19 = vunpack.c.l.bf16 %v2723_v17 }
 0x349   : > { %v1727_v23 = vmul.f32 %v2718_v19, %v1720_v20 }
 0x3c3   : > { %v1389_v42 = vpop.f32.mrf.mxu0  ;;  %v1425_v43 = vpop.f32.mrf.mxu1 }
 0x3c4   : > { %v1390_v45 = vadd.f32 %v2839_v36, %v1389_v42  ;;  %v1426_v46 = vadd.f32 %v2840_v44, %v1425_v43  ;;  %v1724_v43 = vmul.f32 %v2711_v24, %v1720_v20 }
 0x3c6   : > { %v1502_v51 = vpack.c.bf16 %v1390_v45, %v1390_v45  ;;  %v1504_v52 = vpack.c.bf16 %v1426_v46, %v1426_v46  ;;  %v2706_v46 = vunpack.c.l.bf16 %v2705_v34 }
 0x3c8   : > { %v1544_v59 = vunpack.c.l.b16 %v1502_v51  ;;  %v1583_v60 = vunpack.c.l.b16 %v1504_v52 }
 0x3ca   : > { %v1461_v47 = vpop.f32.mrf.mxu2  ;;  %v1497_v48 = vpop.f32.mrf.mxu3 }
 0x3cb   : > { %v1391_v25 = vpop.f32.mrf.mxu0  ;;  %v1427_v35 = vpop.f32.mrf.mxu1  ;;  %v1462_v57 = vadd.f32 %v2841_v49, %v1461_v47  ;;  %v1498_v58 = vadd.f32 %v2842_v50, %v1497_v48  ;;  %v2710_v47 = vunpack.c.l.bf16 %v2721_v21 }
 0x3cc   : > { %v1392_v53 = vadd.f32 %v2839_v36, %v1391_v25  ;;  %v1428_v54 = vadd.f32 %v2840_v44, %v1427_v35  ;;  %v1726_v25 = vmul.f32 %v2715_v41, %v1720_v20 }
 0x3cd   : > { %v1506_v3 = vpack.c.bf16 %v1462_v57, %v1462_v57  ;;  %v1508_v4 = vpack.c.bf16 %v1498_v58, %v1498_v58 }
 0x3ce   : > { %v1503_v55 = vpack.c.bf16 %v1392_v53, %v1392_v53  ;;  %v1505_v56 = vpack.c.bf16 %v1428_v54, %v1428_v54 }
 0x3cf   : > { %v1621_v9 = vunpack.c.l.b16 %v1506_v3  ;;  %v1659_v10 = vunpack.c.l.b16 %v1508_v4 }
 0x3d0   : > { %v1545_v61 = vunpack.c.l.b16 %v1503_v55  ;;  %v1584_v62 = vunpack.c.l.b16 %v1505_v56  ;;  %v1721_v55 = vmul.f32 %v2706_v46, %v1720_v20  ;;  %v1723_v56 = vmul.f32 %v2710_v47, %v1720_v20 }
 0x3d2   : > { %v1546_v63 = vpack.c.b16 %v1545_v61, %v1544_v59  ;;  %v1585_v0 = vpack.c.b16 %v1584_v62, %v1583_v60  ;;  %v1463_v1 = vpop.f32.mrf.mxu2  ;;  %v1499_v2 = vpop.f32.mrf.mxu3 }
 0x3d3   : > { %v1464_v5 = vadd.f32 %v2841_v49, %v1463_v1  ;;  %v1500_v6 = vadd.f32 %v2842_v50, %v1499_v2  ;;  %v1728_v49 = vmul.f32 %v2719_v40, %v1720_v20 }
 0x3d4   : > { %2538 = vmatmul.msk.bf16.vlgmr.msrb.gmra.mxu0 %vm1557_vm7, %v1546_v63  ;;  %2547 = vmatmul.msk.bf16.vlgmr.msrb.gmra.mxu1 %vm1557_vm7, %v1585_v0  ;;  %v2707_v0 = vunpack.c.h.bf16 %v2705_v34 }
 0x3d5   : > { %v1507_v7 = vpack.c.bf16 %v1464_v5, %v1464_v5  ;;  %v1509_v8 = vpack.c.bf16 %v1500_v6, %v1500_v6 }
 0x3d7   : > { %v1622_v11 = vunpack.c.l.b16 %v1507_v7  ;;  %v1660_v12 = vunpack.c.l.b16 %v1509_v8  ;;  %v1722_v8 = vmul.f32 %v2707_v0, %v1720_v20  ;;  %v2678_v0 = vld [vmem:[#allocation3 + $0x10] sm:$0xff] }
 0x3d9   : > { %v1623_v13 = vpack.c.b16 %v1622_v11, %v1621_v9  ;;  %v1661_v14 = vpack.c.b16 %v1660_v12, %v1659_v10 }
 0x3db   : > { %2556 = vmatmul.msk.bf16.vlgmr.msrb.gmra.mxu2 %vm1557_vm7, %v1623_v13  ;;  %2565 = vmatmul.msk.bf16.vlgmr.msrb.gmra.mxu3 %vm1557_vm7, %v1661_v14 }
 0x451   : > { %v1614_v15 = vpop.f32.mrf.mxu1  ;;  %v1576_v45 = vpop.f32.mrf.mxu0 }
 0x452   : > { %v1695_v57 = vmul.f32 0.35355338, %v1576_v45  ;;  %v1697_v58 = vmul.f32 0.35355338, %v1614_v15 }
 0x454   : > { %v1729_v1 = vadd.f32 %v1721_v55, %v1695_v57  ;;  %v1731_v2 = vadd.f32 %v1723_v56, %v1697_v58 }
 0x456   : > { %v1743_v9 = vadd.f32 %v2843_v26, %v1731_v2  ;;  %v1741_v10 = vadd.f32 %v2843_v26, %v1729_v1 }
 0x458   : > { %v1755_v12 = vsel %vm1294_vm15, %v1743_v9, -inf  ;;  %v1749_v13 = vsel %vm1294_vm15, %v1741_v10, -inf }
 0x459   : > { %v1616_v31 = vpop.f32.mrf.mxu1  ;;  %v1578_v5 = vpop.f32.mrf.mxu0 }
 0x45a   : > { %v1698_v42 = vmul.f32 0.35355338, %v1616_v31  ;;  %v1696_v7 = vmul.f32 0.35355338, %v1578_v5 }
 0x45c   : > { %v1732_v35 = vadd.f32 %v1724_v43, %v1698_v42  ;;  %v1730_v11 = vadd.f32 %v1722_v8, %v1696_v7 }
 0x45e   : > { %v1652_v27 = vpop.f32.mrf.mxu2  ;;  %v1690_v29 = vpop.f32.mrf.mxu3  ;;  %v1744_v61 = vadd.f32 %v2843_v26, %v1732_v35  ;;  %v1742_v14 = vadd.f32 %v2843_v26, %v1730_v11 }
 0x45f   : > { %v1699_v32 = vmul.f32 0.35355338, %v1652_v27  ;;  %v1701_v33 = vmul.f32 0.35355338, %v1690_v29 }
 0x460   : > { %v1758_v6 = vsel %vm1294_vm15, %v1744_v61, -inf  ;;  %v1752_v15 = vsel %vm1294_vm15, %v1742_v14, -inf }
 0x461   : > { %v1733_v37 = vadd.f32 %v1725_v22, %v1699_v32  ;;  %v1735_v38 = vadd.f32 %v1727_v23, %v1701_v33 }
 0x463   : > { %v1747_v36 = vadd.f32 %v2843_v26, %v1735_v38  ;;  %v1745_v44 = vadd.f32 %v2843_v26, %v1733_v37 }
 0x465   : > { %v1767_v48 = vsel %vm1294_vm15, %v1747_v36, -inf  ;;  %v1761_v50 = vsel %vm1294_vm15, %v1745_v44, -inf }
 0x466   : > { %1768 = vmax.xlane.f32.xlu0 %v1767_v48  ;;  %v1692_v51 = vpop.f32.mrf.mxu3  ;;  %1762 = vmax.xlane.f32.xlu2 %v1761_v50  ;;  %v1654_v52 = vpop.f32.mrf.mxu2 }
 0x467   : > { %v1702_v53 = vmul.f32 0.35355338, %v1692_v51  ;;  %v1700_v54 = vmul.f32 0.35355338, %v1654_v52 }
 0x469   : > { %v1736_v59 = vadd.f32 %v1728_v49, %v1702_v53  ;;  %v1734_v60 = vadd.f32 %v1726_v25, %v1700_v54 }
 0x46b   : > { %v1748_v62 = vadd.f32 %v2843_v26, %v1736_v59  ;;  %v1746_v63 = vadd.f32 %v2843_v26, %v1734_v60  ;;  %v2681_v59 = vld [vmem:[#allocation3 + $0x28] sm:$0xff]  ;;  %v2683_v60 = vld [vmem:[#allocation3 + $0x38] sm:$0xff] }
 0x46c   : > { %1939 = vmatpush.bf16.msra.mxu2 %v2681_v59  ;;  %1973 = vmatpush.bf16.msra.mxu3 %v2683_v60  ;;  %v2684_v60 = vld [vmem:[%s3629_s12] sm:$0xff] }
 0x46d   : > { %v1770_v3 = vsel %vm1294_vm15, %v1748_v62, -inf  ;;  %v1764_v4 = vsel %vm1294_vm15, %v1746_v63, -inf }
 0x46e   : > { %1771 = vmax.xlane.f32.xlu1 %v1770_v3  ;;  %1765 = vmax.xlane.f32.xlu2 %v1764_v4  ;;  %v2677_v3 = vld [vmem:[#allocation3 + $0x8] sm:$0xff]  ;;  %v2676_v4 = vld [vmem:[#allocation3] sm:$0xff] }
 0x46f   : > { %1759 = vmax.xlane.f32.xlu0 %v1758_v6  ;;  %1871 = vmatpush.bf16.msra.mxu0 %v2677_v3 }
 0x473   : > { %1872 = vmatpush.bf16.msra.mxu0 %v2676_v4 }
 0x476   : > { %1756 = vmax.xlane.f32.xlu2 %v1755_v12  ;;  %1750 = vmax.xlane.f32.xlu1 %v1749_v13 }
 0x47e   : > { %1753 = vmax.xlane.f32.xlu2 %v1752_v15 }
 0x4d9   : > { %v1769_v16 = vpop.xlane.xlu0 %1768  ;;  %v1763_v17 = vpop.xlane.xlu2 %1762 }
 0x4da   : > { %v1779_v18 = vsub.f32 %v1747_v36, %v1769_v16  ;;  %v1777_v19 = vsub.f32 %v1745_v44, %v1763_v17 }
 0x4dc   : > { %v1793_v21 = vmul.f32 1.442695, %v1779_v18  ;;  %v1789_v22 = vmul.f32 1.442695, %v1777_v19 }
 0x4de   : > { %2855 = vpow2.f32 %v1793_v21 }
 0x4df   : > { %2857 = vpow2.f32 %v1789_v22 }
 0x4e1   : > { %v1772_v20 = vpop.xlane.xlu1 %1771  ;;  %v1766_v23 = vpop.xlane.xlu2 %1765 }
 0x4e2   : > { %v1780_v24 = vsub.f32 %v1748_v62, %v1772_v20  ;;  %v1778_v27 = vsub.f32 %v1746_v63, %v1766_v23  ;;  %v1760_v29 = vpop.xlane.xlu0 %1759  ;;  %v2682_v62 = vld [vmem:[#allocation3 + $0x30] sm:$0xff]  ;;  %v2679_v63 = vld [vmem:[#allocation3 + $0x18] sm:$0xff] }
 0x4e3   : > { %v1776_v31 = vsub.f32 %v1744_v61, %v1760_v29  ;;  %v2680_v61 = vld [vmem:[#allocation3 + $0x20] sm:$0xff]  ;;  %1974 = vmatpush.bf16.msra.mxu3 %v2682_v62  ;;  %1905 = vmatpush.bf16.msra.mxu1 %v2679_v63 }
 0x4e4   : > { %v3471_v32 = vpop.eup %2855  ;;  %v1795_v33 = vmul.f32 1.442695, %v1780_v24  ;;  %v1791_v34 = vmul.f32 1.442695, %v1778_v27  ;;  %1940 = vmatpush.bf16.msra.mxu2 %v2680_v61 }
 0x4e5   : > { %v3473_v37 = vpop.eup %2857  ;;  %v1787_v38 = vmul.f32 1.442695, %v1776_v31  ;;  %v1815_v26 = vsel %vm1294_vm15, %v3471_v32, 0.0 }
 0x4e6   : > { %2859 = vpow2.f32 %v1795_v33  ;;  %v1809_v40 = vsel %vm1294_vm15, %v3473_v37, 0.0  ;;  %1816 = vadd.xlane.f32.xlu2 %v1815_v26 }
 0x4e7   : > { %2861 = vpow2.f32 %v1791_v34  ;;  %1810 = vadd.xlane.f32.xlu0 %v1809_v40  ;;  %1906 = vmatpush.bf16.msra.mxu1 %v2678_v0 }
 0x4e8   : > { %2863 = vpow2.f32 %v1787_v38 }
 0x4e9   : > { %v1757_v41 = vpop.xlane.xlu2 %1756  ;;  %v1751_v42 = vpop.xlane.xlu1 %1750 }
 0x4ea   : > { %v1775_v43 = vsub.f32 %v1743_v9, %v1757_v41  ;;  %v1773_v36 = vsub.f32 %v1741_v10, %v1751_v42 }
 0x4ec   : > { %v2860_v44 = vpop.eup %2859  ;;  %v1785_v45 = vmul.f32 1.442695, %v1775_v43  ;;  %v1781_v46 = vmul.f32 1.442695, %v1773_v36 }
 0x4ed   : > { %v2862_v47 = vpop.eup %2861  ;;  %v1818_v48 = vsel %vm1294_vm15, %v2860_v44, 0.0 }
 0x4ee   : > { %v3480_v49 = vpop.eup %2863  ;;  %2865 = vpow2.f32 %v1785_v45  ;;  %v1812_v50 = vsel %vm1294_vm15, %v2862_v47, 0.0 }
 0x4ef   : > { %2867 = vpow2.f32 %v1781_v46  ;;  %1819 = vadd.xlane.f32.xlu0 %v1818_v48  ;;  %1813 = vadd.xlane.f32.xlu1 %v1812_v50  ;;  %v1806_v25 = vsel %vm1294_vm15, %v3480_v49, 0.0 }
 0x4f0   : > { %1807 = vadd.xlane.f32.xlu2 %v1806_v25 }
 0x4f1   : > { %v1754_v35 = vpop.xlane.xlu2 %1753 }
 0x4f2   : > { %v1774_v51 = vsub.f32 %v1742_v14, %v1754_v35 }
 0x4f4   : > { %v3485_v52 = vpop.eup %2865  ;;  %v1783_v53 = vmul.f32 1.442695, %v1774_v51 }
 0x4f5   : > { %v3487_v54 = vpop.eup %2867  ;;  %v1803_v55 = vsel %vm1294_vm15, %v3485_v52, 0.0 }
 0x4f6   : > { %2869 = vpow2.f32 %v1783_v53  ;;  %v1797_v56 = vsel %vm1294_vm15, %v3487_v54, 0.0 }
 0x4f7   : > { %1804 = vadd.xlane.f32.xlu1 %v1803_v55  ;;  %1798 = vadd.xlane.f32.xlu0 %v1797_v56 }
 0x4fc   : > { %v3493_v57 = vpop.eup %2869 }
 0x4fd   : > { %v1800_v58 = vsel %vm1294_vm15, %v3493_v57, 0.0 }
 0x4ff   : > { %1801 = vadd.xlane.f32.xlu1 %v1800_v58 }
 0x559   : > { %v1817_v1 = vpop.xlane.xlu2 %1816 }
 0x55a   : > { %v1811_v2 = vpop.xlane.xlu0 %1810  ;;  %2871 = vrcp.f32 %v1817_v1 }
 0x55b   : > { %2873 = vrcp.f32 %v1811_v2 }
 0x560   : > { %v2872_v7 = vpop.eup %2871 }
 0x561   : > { %v2874_v9 = vpop.eup %2873  ;;  %v1835_v10 = vmul.f32 %v2872_v7, %v3471_v32 }
 0x562   : > { %v1820_v5 = vpop.xlane.xlu0 %1819  ;;  %v1814_v6 = vpop.xlane.xlu1 %1813  ;;  %v1833_v11 = vmul.f32 %v2874_v9, %v3473_v37 }
 0x563   : > { %2875 = vrcp.f32 %v1820_v5  ;;  %v1808_v8 = vpop.xlane.xlu2 %1807  ;;  %v1843_v14 = vpack.c.bf16 %v1835_v10, %v1835_v10 }
 0x564   : > { %2877 = vrcp.f32 %v1814_v6  ;;  %v1841_v18 = vpack.c.bf16 %v1833_v11, %v1833_v11 }
 0x565   : > { %2879 = vrcp.f32 %v1808_v8  ;;  %v1949_v23 = vunpack.c.l.b16 %v1843_v14 }
 0x566   : > { %v1915_v27 = vunpack.c.l.b16 %v1841_v18 }
 0x569   : > { %v2876_v12 = vpop.eup %2875 }
 0x56a   : > { %v2878_v13 = vpop.eup %2877  ;;  %v1836_v15 = vmul.f32 %v2876_v12, %v2860_v44  ;;  %v1799_v16 = vpop.xlane.xlu0 %1798 }
 0x56b   : > { %v1805_v17 = vpop.xlane.xlu1 %1804  ;;  %v1834_v19 = vmul.f32 %v2878_v13, %v2862_v47  ;;  %v2880_v21 = vpop.eup %2879 }
 0x56c   : > { %v1844_v22 = vpack.c.bf16 %v1836_v15, %v1836_v15  ;;  %2881 = vrcp.f32 %v1805_v17  ;;  %v1832_v31 = vmul.f32 %v2880_v21, %v3480_v49  ;;  %v2844_v15 = vld [vmem:[%s3630_s13] ss:$0 sm:$0xff] }
 0x56d   : > { %v1842_v20 = vpack.c.bf16 %v1834_v19, %v1834_v19  ;;  %2883 = vrcp.f32 %v1799_v16 }
 0x56e   : > { %v1950_v24 = vunpack.c.l.b16 %v1844_v22  ;;  %v1840_v26 = vpack.c.bf16 %v1832_v31, %v1832_v31 }
 0x56f   : > { %v1916_v29 = vunpack.c.l.b16 %v1842_v20 }
 0x570   : > { %v1951_v32 = vpack.c.b16 %v1950_v24, %v1949_v23  ;;  %v1882_v43 = vunpack.c.l.b16 %v1840_v26 }
 0x571   : > { %v1917_v33 = vpack.c.b16 %v1916_v29, %v1915_v27 }
 0x572   : > { %v2882_v34 = vpop.eup %2881  ;;  %2601 = vmatmul.msk.bf16.vlgmr.msra.gmra.mxu3 %vm1294_vm15, %v1951_v32 }
 0x573   : > { %v1802_v37 = vpop.xlane.xlu1 %1801  ;;  %v2884_v38 = vpop.eup %2883  ;;  %v1831_v40 = vmul.f32 %v2882_v34, %v3485_v52  ;;  %2592 = vmatmul.msk.bf16.vlgmr.msra.gmra.mxu2 %vm1294_vm15, %v1917_v33 }
 0x574   : > { %2885 = vrcp.f32 %v1802_v37  ;;  %v1829_v42 = vmul.f32 %v2884_v38, %v3487_v54  ;;  %v2687_v38 = vld [vmem:[%s3633_s16 + $0x8] sm:$0xff] }
 0x575   : > { %v1839_v41 = vpack.c.bf16 %v1831_v40, %v1831_v40  ;;  %2139 = vmatpush.bf16.msrb.mxu1 %v2687_v38 }
 0x576   : > { %v1837_v46 = vpack.c.bf16 %v1829_v42, %v1829_v42  ;;  %v2686_v42 = vld [vmem:[%s3633_s16] sm:$0xff] }
 0x577   : > { %v1881_v36 = vunpack.c.l.b16 %v1839_v41 }
 0x578   : > { %v1847_v49 = vunpack.c.l.b16 %v1837_v46 }
 0x579   : > { %v1883_v45 = vpack.c.b16 %v1882_v43, %v1881_v36  ;;  %2140 = vmatpush.bf16.msrb.mxu1 %v2686_v42 }
 0x57a   : > { %v2886_v44 = vpop.eup %2885 }
 0x57b   : > { %v1830_v47 = vmul.f32 %v2886_v44, %v3493_v57  ;;  %2583 = vmatmul.msk.bf16.vlgmr.msra.gmra.mxu1 %vm1294_vm15, %v1883_v45  ;;  %v2685_v57 = vld [vmem:[%s3629_s12 + $0x8] sm:$0xff] }
 0x57c   : > { %2043 = vmatpush.bf16.msrb.mxu0 %v2685_v57 }
 0x57d   : > { %v1838_v48 = vpack.c.bf16 %v1830_v47, %v1830_v47 }
 0x57f   : > { %v1848_v50 = vunpack.c.l.b16 %v1838_v48 }
 0x580   : > { %2044 = vmatpush.bf16.msrb.mxu0 %v2684_v60 }
 0x581   : > { %v1849_v25 = vpack.c.b16 %v1848_v50, %v1847_v49 }
 0x583   : > { %2574 = vmatmul.msk.bf16.vlgmr.msra.gmra.mxu0 %vm1294_vm15, %v1849_v25 }
 0x5f5   : > { %v1976_v35 = vpop.f32.mrf.mxu3 }
 0x5f6   : > { %v1942_v51 = vpop.f32.mrf.mxu2 }
 0x5f8   : > { %v1908_v52 = vpop.f32.mrf.mxu1 }
 0x5fd   : > { %v1978_v53 = vpop.f32.mrf.mxu3 }
 0x5fe   : > { %v1944_v54 = vpop.f32.mrf.mxu2  ;;  %v2832_v55 = vpack.i.bf16 %v1978_v53, %v1976_v35 }
 0x5ff   : > { %v2827_v56 = vpack.i.bf16 %v1944_v54, %v1942_v51 }
 0x600   : > { %v1910_v58 = vpop.f32.mrf.mxu1  ;;  %2833 = vrot.lane.b32.xlu1 %v2832_v55, %s2993_s27  ;;  %v1874_v61 = vpop.f32.mrf.mxu0  ;;  %s3683_s27 = sld [smem:[#allocation27_spill]] }
 0x601   : > { %v2822_v59 = vpack.i.bf16 %v1910_v58, %v1908_v52  ;;  %2828 = vrot.lane.b32.xlu0 %v2827_v56, %s2994_s22 }
 0x603   : > { %2823 = vrot.lane.b32.xlu2 %v2822_v59, %s2995_s0  ;;  %v2846_v59 = vld [vmem:[%s3632_s15] ss:$0 sm:$0xff]  ;;  %s3681_s0 = sld [smem:[#allocation24_spill]] }
 0x606   : > { %s3684_s22 = smov %s3683_s27 }
 0x607   : > { %s2915_s18 = scalar_lea.hbm %s3684_s22, 32 }
 0x608   : > { %v1876_v5 = vpop.f32.mrf.mxu0 }
 0x65d   : > { %v2824_v62 = vpop.permute.xlu2 %2823 }
 0x65e   : > { %v2826_v63 = vunpack.i.h.bf16 %v2824_v62  ;;  %v2825_v0 = vunpack.i.l.bf16 %v2824_v62 }
 0x660   : > { %v2006_v8 = vsel %vm1557_vm7, %v1876_v5, %v2826_v63  ;;  %v2005_v9 = vsel %vm1557_vm7, %v1874_v61, %v2825_v0  ;;  %v2847_v5 = vld [vmem:[%s3681_s0] ss:$0 sm:$0xff]  ;;  %s2241_s0 = scalar_lea.hbm %s3683_s27, %s2640_s28 }
 0x661   : > { %s2244_s26 = sshll.u32 %s2241_s0, 4  ;;  %s2245_s26 = int_to_ptr.hbm [resolvable:$true] %s2244_s26 }
 0x662   : > { %s2909_s1 = sshra.s32 %s2245_s26, 4  ;;  %s2910_s1 = int_to_ptr.hbm [resolvable:$true] %s2909_s1 }
 0x663   : > { %p2916_p6 = scmp.lt.s32.totalorder %s2910_s1, %s3684_s22 }
 0x672   : > { %v2834_v1 = vpop.permute.xlu1 %2833 }
 0x673   : > { %v2829_v2 = vpop.permute.xlu0 %2828  ;;  %v2836_v3 = vunpack.i.h.bf16 %v2834_v1  ;;  %v2835_v4 = vunpack.i.l.bf16 %v2834_v1  ;;  %v2691_v1 = vld [vmem:[%s3680_s17 + $0x18] sm:$0xff] }
 0x674   : > { %v2831_v6 = vunpack.i.h.bf16 %v2829_v2  ;;  %v2830_v7 = vunpack.i.l.bf16 %v2829_v2  ;;  %2210 = vmatpush.bf16.msrb.mxu2 %v2691_v1  ;;  %v2690_v2 = vld [vmem:[%s3680_s17 + $0x10] sm:$0xff] }
 0x676   : > { %v2008_v10 = vsel %vm2007_vm8, %v2005_v9, %v2830_v7  ;;  %v2009_v11 = vsel %vm2007_vm8, %v2006_v8, %v2831_v6 }
 0x677   : > { %v2011_v12 = vsel %vm2010_vm9, %v2008_v10, %v2835_v4  ;;  %v2012_v13 = vsel %vm2010_vm9, %v2009_v11, %v2836_v3  ;;  %v2689_v3 = vld [vmem:[%s3680_s17 + $0x8] sm:$0xff]  ;;  %v2688_v4 = vld [vmem:[%s3680_s17] sm:$0xff] }
 0x678   : > { %v2013_v14 = vpack.c.bf16 %v2012_v13, %v2011_v12  ;;  %2211 = vmatpush.bf16.msrb.mxu2 %v2690_v2 }
 0x67a   : > { %2610 = vmatmul.msk.bf16.vlgmr.msrb.gmra.mxu0 %vm1294_vm15, %v2013_v14 }
 0x67c   : > { %2212 = vmatpush.bf16.msrb.mxu2 %v2689_v3 }
 0x680   : > { %2213 = vmatpush.bf16.msrb.mxu2 %v2688_v4 }
 0x6f7   : > { %v2046_v16 = vpop.f32.mrf.mxu0 }
 0x6f8   : > { %v2047_v17 = vadd.f32 %v2844_v15, %v2046_v16 }
 0x6fa   : > { %v3520_v18 = vadd.f32 %v3378_v28, %v2047_v17 }
 0x6fc   : > { %v2055_v19 = vsel %vm1294_vm15, %v3520_v18, 0.0 }
 0x6fd   : > { %2056 = vadd.xlane.f32.xlu2 %v2055_v19 }
 0x6ff   : > { %v2048_v21 = vpop.f32.mrf.mxu0 }
 0x700   : > { %v2049_v22 = vadd.f32 %v2844_v15, %v2048_v21 }
 0x702   : > { %v3525_v20 = vadd.f32 %v3382_v30, %v2049_v22 }
 0x704   : > { %v2058_v23 = vsel %vm1294_vm15, %v3525_v20, 0.0 }
 0x705   : > { %2059 = vadd.xlane.f32.xlu0 %v2058_v23 }
 0x770   : > { %v2057_v24 = vpop.xlane.xlu2 %2056 }
 0x771   : > { %v2061_v27 = vmul.f32 %v2057_v24, %v3386_v39 }
 0x773   : > { %v2063_v29 = vsub.f32 %v3520_v18, %v2061_v27 }
 0x775   : > { %v2065_v28 = vmul.f32 %v2063_v29, %v2063_v29 }
 0x777   : > { %v2067_v31 = vsel %vm1294_vm15, %v2065_v28, 0.0 }
 0x778   : > { %v2060_v32 = vpop.xlane.xlu0 %2059  ;;  %2068 = vadd.xlane.f32.xlu1 %v2067_v31 }
 0x779   : > { %v2062_v33 = vmul.f32 %v2060_v32, %v3386_v39 }
 0x77b   : > { %v2064_v34 = vsub.f32 %v3525_v20, %v2062_v33 }
 0x77d   : > { %v2066_v30 = vmul.f32 %v2064_v34, %v2064_v34 }
 0x77f   : > { %v2070_v37 = vsel %vm1294_vm15, %v2066_v30, 0.0 }
 0x780   : > { %2071 = vadd.xlane.f32.xlu2 %v2070_v37 }
 0x7eb   : > { %v2069_v26 = vpop.xlane.xlu1 %2068 }
 0x7ec   : > { %v2073_v40 = vmul.f32 %v2069_v26, %v3386_v39 }
 0x7ee   : > { %v2075_v41 = vadd.f32 1e-05, %v2073_v40 }
 0x7f0   : > { %2887 = vrsqrt.f32 %v2075_v41  ;;  %vm2083_vm11 = vweird.f32 %v2075_v41 }
 0x7f3   : > { %v2072_v43 = vpop.xlane.xlu2 %2071 }
 0x7f4   : > { %v2074_v36 = vmul.f32 %v2072_v43, %v3386_v39  ;;  %v2845_v39 = vld [vmem:[%s3631_s14] ss:$0 sm:$0xff] }
 0x7f6   : > { %v2888_v44 = vpop.eup %2887  ;;  %v2076_v45 = vadd.f32 1e-05, %v2074_v36 }
 0x7f7   : > { %v2078_v46 = vmul.f32 %v2888_v44, %v2075_v41  ;;  %vm2084_vm10 = vweird.f32 %v2888_v44 }
 0x7f8   : > { %2889 = vrsqrt.f32 %v2076_v45  ;;  %vm2085_vm12 = vmor %vm2083_vm11, %vm2084_vm10  ;;  %vm2093_vm14 = vweird.f32 %v2076_v45 }
 0x7f9   : > { %v2079_v47 = vmul.f32 %v2888_v44, %v2078_v46 }
 0x7fb   : > { %v2080_v48 = vmul.f32 0.5, %v2079_v47 }
 0x7fd   : > { %v2081_v49 = vsub.f32 1.5, %v2080_v48 }
 0x7fe   : > { %v2890_v50 = vpop.eup %2889 }
 0x7ff   : > { %v2082_v25 = vmul.f32 %v2888_v44, %v2081_v49  ;;  %v2088_v35 = vmul.f32 %v2890_v50, %v2076_v45  ;;  %vm2094_vm13 = vweird.f32 %v2890_v50 }
 0x800   : > { %vm2095_vm0 = vmor %vm2093_vm14, %vm2094_vm13 }
 0x801   : > { %v2089_v51 = vmul.f32 %v2890_v50, %v2088_v35  ;;  %v2086_v52 = vsel %vm2085_vm12, %v2888_v44, %v2082_v25 }
 0x802   : > { %v2097_v55 = vmul.f32 %v2086_v52, %v2063_v29 }
 0x803   : > { %v2090_v53 = vmul.f32 0.5, %v2089_v51 }
 0x804   : > { %v2102_v57 = vmul.f32 %v2845_v39, %v2097_v55 }
 0x805   : > { %v2091_v54 = vsub.f32 1.5, %v2090_v53 }
 0x806   : > { %v2107_v62 = vadd.f32 %v2846_v59, %v2102_v57 }
 0x807   : > { %v2092_v56 = vmul.f32 %v2890_v50, %v2091_v54 }
 0x809   : > { %v2096_v58 = vsel %vm2095_vm0, %v2890_v50, %v2092_v56 }
 0x80a   : > { %v2098_v60 = vmul.f32 %v2096_v58, %v2064_v34  ;;  %v2848_v34 = vld [vmem:[%s3682_s19] ss:$0 sm:$0xff]  ;;  %s2911_s19 = scalar_lea.hbm %s2910_s1, 8 }
 0x80b   : > { %p2912_p3 = scmp.ne.s32.totalorder %s2910_s1, %s2911_s19  ;;  %p2917_p7 = scmp.lt.s32.totalorder %s2915_s18, %s2911_s19 }
 0x80c   : > { %v2103_v61 = vmul.f32 %v2845_v39, %v2098_v60 }
 0x80d   : > { %p2913_p4 = pnand %p2912_p3, %p3166_p8  ;;  %p2918_p10 = por %p2917_p7, %p2916_p6 }
 0x80e   : > { %v2108_v63 = vadd.f32 %v2846_v59, %v2103_v61 }
 0x80f   : > { %p2914_p5 = pneg %p2913_p4 }
 0x810   : > { %v2109_v0 = vpack.c.bf16 %v2108_v63, %v2107_v62 }
 0x811   : > { %p2919_p11 = pnand %p2918_p10, %p2914_p5 }
 0x812   : > { %2619 = vmatmul.msk.bf16.vlgmr.msrb.gmra.mxu1 %vm1294_vm15, %v2109_v0  ;;  %vm2202_vm15 = vcmask 523264  }
 0x88f   : > { %v2142_v6 = vpop.f32.mrf.mxu1 }
 0x890   : > { %v2143_v7 = vadd.f32 %v2847_v5, %v2142_v6 }
 0x892   : > { %v2149_v8 = vmul.f32 0.044715, %v2143_v7  ;;  %v2147_v27 = vmul.f32 0.5, %v2143_v7 }
 0x894   : > { %v2151_v9 = vmul.f32 %v2149_v8, %v2143_v7 }
 0x896   : > { %v2153_v10 = vmul.f32 %v2151_v9, %v2143_v7 }
 0x897   : > { %v2144_v11 = vpop.f32.mrf.mxu1 }
 0x898   : > { %v2155_v12 = vadd.f32 %v2153_v10, %v2143_v7  ;;  %v2145_v13 = vadd.f32 %v2847_v5, %v2144_v11 }
 0x89a   : > { %v2150_v14 = vmul.f32 0.044715, %v2145_v13  ;;  %v2157_v15 = vmul.f32 0.7978846, %v2155_v12  ;;  %v2148_v29 = vmul.f32 0.5, %v2145_v13 }
 0x89c   : > { %v2152_v16 = vmul.f32 %v2150_v14, %v2145_v13  ;;  %2891 = vtanh.f32 %v2157_v15 }
 0x89e   : > { %v2154_v17 = vmul.f32 %v2152_v16, %v2145_v13 }
 0x8a0   : > { %v2156_v19 = vadd.f32 %v2154_v17, %v2145_v13 }
 0x8a2   : > { %v2158_v21 = vmul.f32 0.7978846, %v2156_v19  ;;  %v2892_v22 = vpop.eup %2891 }
 0x8a3   : > { %v2161_v23 = vadd.f32 1.0, %v2892_v22 }
 0x8a4   : > { %2893 = vtanh.f32 %v2158_v21 }
 0x8a5   : > { %v2163_v31 = vmul.f32 %v2161_v23, %v2147_v27 }
 0x8aa   : > { %v2894_v24 = vpop.eup %2893 }
 0x8ab   : > { %v2162_v28 = vadd.f32 1.0, %v2894_v24 }
 0x8ad   : > { %v2164_v32 = vmul.f32 %v2162_v28, %v2148_v29 }
 0x8af   : > { %v2165_v33 = vpack.c.bf16 %v2164_v32, %v2163_v31 }
 0x8b1   : > { %2636 = vmatmul.msk.bf16.vlgmr.msrb.gmra.mxu2 %vm2202_vm15, %v2165_v33 }
 0x934   : > { %v2215_v30 = vpop.f32.mrf.mxu2 }
 0x935   : > { %v2216_v37 = vadd.f32 %v2848_v34, %v2215_v30 }
 0x937   : > { %v2220_v38 = vadd.f32 %v2216_v37, %v3520_v18 }
 0x939   : > { %v2222_v26 = vpack.c.bf16 %v2220_v38, %v2220_v38 }
 0x93b   : > { %2225 = vst.msk [vmem:[%s3212_s25] sm:$0xf] %vm2224_vm1, %v2222_v26 }
 0x93c   : > { %v2217_v40 = vpop.f32.mrf.mxu2 }
 0x93d   : > { %v2218_v41 = vadd.f32 %v2848_v34, %v2217_v40 }
 0x93f   : > { %v2221_v42 = vadd.f32 %v2218_v41, %v3525_v20 }
 0x941   : > { %v2223_v43 = vpack.c.bf16 %v2221_v42, %v2221_v42 }
 0x943   : > { %2226 = vst.msk [vmem:[%s3212_s25 + $0x4] sm:$0xf] %vm2224_vm1, %v2223_v43 }
 0x944   : > { %2922 = shalt.err (!%p2919_p11)
}
 0x945   : > { %s2996_s25 = smov 64   ;;  %s2997_s20 = smov 4  }
 0x946   : > { %2724 = dma.vmem_to_hbm [thread:$0]  (%p3166_p8), %s2243_s3, 128, %s2245_s26, %s2228_s30, %s2996_s25, %s2996_s25, %s2997_s20  }
 0x947 PF: > { %s3686_s29 = sld [smem:[#allocation9_spill]]  ;;  %p2730_p12 = scmp.ge.s32.totalorder %s2989_s4, 2 }
 0x949   : > { %p2727_p13 = pnand %p2730_p12, %p3170_p9 }
 0x94b   : > { %p2728_p0 = pneg %p2727_p13 }
 0x94d   : > { %s2259_s0 = sand.u32 1, %s3686_s29  }
 0x94e   : > { %s2260_s24 = scalar_lea.sflag [#allocation7], %s2259_s0 }
 0x94f   : > { %2956 = dma.done.wait (%p2728_p0), %s2260_s24, 128  }
 0x950   : > { %2958 = vsyncadd (%p2728_p0), %s2260_s24, 4294967168  ;;  %s34_s4 = sadd.s32 1, %s2989_s4   ;;  %s3688_s1 = sld [smem:[#allocation10_spill]] }
 0x951   : > { %p31_p1 = scmp.ge.s32.totalorder %s34_s4, 6   ;;  %s3689_s25 = sld [smem:[#allocation17_spill]] }
 0x952   : > { %s3690_s3 = sld [smem:[#allocation11_spill]]  ;;  %s3694_s24 = smov %s2965_s2 }
 0x953   : > { %s3691_s26 = sld [smem:[#allocation12_spill]]  ;;  %33 = sbr.rel (!%p31_p1) target bundleno = 23 (0x17), region = 216 }
 0x954   : > { %s3692_s27 = sld [smem:[#allocation13_spill]] }
 0x955   : > { %s3693_s28 = sld [smem:[#allocation14_spill]] }
 0x956   : > { %s3695_s2 = smov %s3688_s1 }
 0x958   :  { %2266 = vsyncpa [#allocation7], 1 }
 0x959   :  { %2268 = vsyncpa [#allocation7 + $0x1], 1 }

</bundles_post_ra>
